<compile_context>
chip_gen: v6e
topology: v6e:2x2x1
jax: 0.10.0
libtpu: 0.0.40
codegen_flags: <defaults>
</compile_context>

<pallas_src>
import jax
import jax.numpy as jnp
from jax.experimental import pallas as pl
from jax.experimental.pallas import tpu as pltpu

GEM_EPS = 1e-6
OUT_PAD = 128       # fused head output padded to one full lane-width


def _mixnet_head_kernel(p_ref, x_ref, w_ref, out_ref, pooled_ref):
    """GeM pool over the spatial axis + fused bias-free linear heads.

    p_ref     : [2] f32 SMEM          -- [p, 1/p], scalar-prefetched
    x_ref     : [TB, HW, C] bf16 VMEM -- feature-map tile, C on the lane axis
    w_ref     : [C, OUT_PAD] f32 VMEM -- fused head weights (col 0 = fc1, 1..5 = fc2)
    out_ref   : [TB, OUT_PAD] f32 VMEM
    pooled_ref: [TB, C] f32 VMEM scratch
    """
    p = p_ref[0]
    inv_p = p_ref[1]

    # clamp(min=eps) then upcast: keep pow/pool math in f32.
    xc = jnp.maximum(x_ref[...].astype(jnp.float32), GEM_EPS)        # [TB, HW, C]

    is_p3 = jnp.abs(p - 3.0) < 1e-6

    @pl.when(is_p3)
    def _():
        # Common GeM case p == 3: cube on the VPU (4 VALU slots) instead of
        # 2 EUP ops per element on the single EUP slot.
        pooled_ref[...] = jnp.mean(xc * xc * xc, axis=1)              # [TB, C]

    @pl.when(jnp.logical_not(is_p3))
    def _():
        # General case: x**p = exp(p * log(x)) for x > 0 (EUP path).
        pooled_ref[...] = jnp.mean(jnp.exp(p * jnp.log(xc)), axis=1)  # [TB, C]

    # pooled**(1/p) on the tiny [TB, C] tensor (negligible EUP cost).
    feat = jnp.exp(inv_p * jnp.log(pooled_ref[...]))                  # [TB, C]

    # Fused fc1 + fc2: one lane-dense MXU dot + one unmasked lane-dense store.
    out_ref[...] = jnp.dot(feat, w_ref[...], preferred_element_type=jnp.float32)


def _pick_batch_tile(batch, max_tb):
    """Largest batch tile <= max_tb keeping the (tb, 128) output block legal."""
    if batch <= max_tb:
        return batch
    tb = (max_tb // 8) * 8
    while tb >= 8:
        if batch % tb == 0:
            return tb
        tb -= 8
    return batch      # fall back to a single full-batch block


def mixnet_head_forward(feats_nchw, p, w1, w2, *, max_batch_tile=8):
    """feats_nchw: [B, C, H, W]; p: [1] f32 (GeM exponent); w1: [1, C]; w2: [5, C]."""
    B, C, H, W = feats_nchw.shape
    HW = H * W

    # [B, C, H, W] -> [B, HW, C] (C on lanes); bf16 halves HBM->VMEM DMA bytes.
    x = jnp.transpose(feats_nchw.reshape(B, C, HW), (0, 2, 1)).astype(jnp.bfloat16)

    # Fused, lane-padded head weight: col 0 = fc1, cols 1..5 = fc2, rest zero.
    w_fused = jnp.zeros((C, OUT_PAD), jnp.float32)
    w_fused = w_fused.at[:, 0:1].set(jnp.transpose(w1).astype(jnp.float32))
    w_fused = w_fused.at[:, 1:6].set(jnp.transpose(w2).astype(jnp.float32))

    pv = p.astype(jnp.float32).reshape(-1)[0]
    p_arr = jnp.stack([pv, 1.0 / pv])            # [p, 1/p] -> SMEM (keeps divide off vector path)

    tb = _pick_batch_tile(B, max_batch_tile)
    grid = (B // tb,)

    out = pl.pallas_call(
        _mixnet_head_kernel,
        out_shape=jax.ShapeDtypeStruct((B, OUT_PAD), jnp.float32),
        grid_spec=pltpu.PrefetchScalarGridSpec(
            num_scalar_prefetch=1,               # p_arr lands in SMEM before the grid runs
            grid=grid,
            in_specs=[
                pl.BlockSpec((tb, HW, C), lambda i, p_sc: (i, 0, 0)),     # feature tile
                pl.BlockSpec((C, OUT_PAD), lambda i, p_sc: (0, 0)),       # fused weights
            ],
            out_specs=pl.BlockSpec((tb, OUT_PAD), lambda i, p_sc: (i, 0)),
            scratch_shapes=[pltpu.VMEM((tb, C), jnp.float32)],
        ),
        compiler_params=pltpu.CompilerParams(
            dimension_semantics=("parallel",),   # shard batch tiles across v7x's 2 TCs
            vmem_limit_bytes=32 * 1024 * 1024,   # explicit; leaves headroom on v7x (64 MiB phys)
        ),
        cost_estimate=pl.CostEstimate(
            flops=2 * B * C * OUT_PAD + 4 * B * HW * C,
            transcendentals=2 * B * HW * C + 2 * B * C,
            bytes_accessed=B * HW * C * 2 + C * OUT_PAD * 4 + B * OUT_PAD * 4 + 8,
        ),
    )(p_arr, x, w_fused)

    rg = out[:, 0:1]
    cls = out[:, 1:6]
    return rg, cls


def mixnet_head_reference(feats_nchw, p, w1, w2):
    """Pure-JAX reference mirroring the PyTorch semantics (GeM + fc1/fc2)."""
    x = feats_nchw.astype(jnp.float32)
    pv = p.astype(jnp.float32).reshape(-1)[0]
    xc = jnp.maximum(x, GEM_EPS)                         # clamp(min=eps)
    pooled = jnp.mean(xc ** pv, axis=(-2, -1))           # avg_pool2d over full H,W
    feat = pooled ** (1.0 / pv)                          # [B, C]
    rg = feat @ jnp.transpose(w1).astype(jnp.float32)    # [B, 1]
    cls = feat @ jnp.transpose(w2).astype(jnp.float32)   # [B, 5]
    return rg, cls


if __name__ == "__main__":
    # Small synthetic "backbone feature map": B=16, C(in_features)=32, H=W=8.
    B, C, H, W = 16, 32, 8, 8

    key = jax.random.PRNGKey(0)
    k_x, k_w1, k_w2 = jax.random.split(key, 3)

    feats = jax.random.normal(k_x, (B, C, H, W), dtype=jnp.float32)
    # Quantize once to bf16 so the kernel (bf16 HBM traffic) and the f32
    # reference see numerically identical inputs.
    feats = feats.astype(jnp.bfloat16).astype(jnp.float32)

    p3 = jnp.ones((1,), dtype=jnp.float32) * 3.0                    # GeM p init (fast path)
    w1 = jax.random.normal(k_w1, (1, C), dtype=jnp.float32) * 0.02  # fc1 weight
    w2 = jax.random.normal(k_w2, (5, C), dtype=jnp.float32) * 0.02  # fc2 weight

    # p == 3 (VPU cube fast path)
    rg, cls = mixnet_head_forward(feats, p3, w1, w2)
    jax.block_until_ready((rg, cls))
    rg_ref, cls_ref = mixnet_head_reference(feats, p3, w1, w2)
    assert rg.shape == (B, 1) and cls.shape == (B, 5)
    assert jnp.allclose(rg, rg_ref, rtol=1e-2, atol=1e-3)
    assert jnp.allclose(cls, cls_ref, rtol=1e-2, atol=1e-3)

    # p != 3 (general EUP exp/log path)
    p25 = jnp.ones((1,), dtype=jnp.float32) * 2.5
    rg2, cls2 = mixnet_head_forward(feats, p25, w1, w2)
    jax.block_until_ready((rg2, cls2))
    rg2_ref, cls2_ref = mixnet_head_reference(feats, p25, w1, w2)
    assert jnp.allclose(rg2, rg2_ref, rtol=1e-2, atol=1e-3)
    assert jnp.allclose(cls2, cls2_ref, rtol=1e-2, atol=1e-3)

    print("KERNEL_OK")
</pallas_src>

<mosaic_0001>
module attributes {stable_mosaic.version = 11 : i64} {
  func.func @_mixnet_head_kernel(%arg0: i32, %arg1: memref<2xf32, #tpu.memory_space<smem>>, %arg2: memref<8x64x32xbf16, #tpu.memory_space<vmem>>, %arg3: memref<32x128xf32, #tpu.memory_space<vmem>>, %arg4: memref<8x128xf32, #tpu.memory_space<vmem>>, %arg5: memref<8x32xf32, #tpu.memory_space<vmem>>) attributes {dimension_semantics = [#tpu.dimension_semantics<parallel>], iteration_bounds = array<i64: 2>, scalar_prefetch = 1 : i64, scratch_operands = 1 : i64, tpu.core_type = #tpu.core_type<tc>, window_params = [{transform_indices = @transform_0, window_bounds = array<i64: 8, 64, 32>}, {pipeline_mode = #tpu.pipeline_mode<synchronous>, transform_indices = @transform_1, window_bounds = array<i64: 32, 128>}, {transform_indices = @transform_2, window_bounds = array<i64: 8, 128>}]} {
    %c0 = arith.constant 0 : index
    %0 = memref.load %arg1[%c0] : memref<2xf32, #tpu.memory_space<smem>>
    %c1 = arith.constant 1 : index
    %1 = memref.load %arg1[%c1] : memref<2xf32, #tpu.memory_space<smem>>
    %c0_0 = arith.constant 0 : index
    %c0_1 = arith.constant 0 : index
    %c0_2 = arith.constant 0 : index
    %2 = vector.load %arg2[%c0_0, %c0_1, %c0_2] : memref<8x64x32xbf16, #tpu.memory_space<vmem>>, vector<8x64x32xbf16>
    %3 = arith.extf %2 : vector<8x64x32xbf16> to vector<8x64x32xf32>
    %cst = arith.constant 9.99999997E-7 : f32
    %4 = vector.broadcast %cst : f32 to vector<8x64x32xf32>
    %5 = arith.maximumf %3, %4 : vector<8x64x32xf32>
    %cst_3 = arith.constant 3.000000e+00 : f32
    %6 = arith.subf %0, %cst_3 : f32
    %7 = math.absf %6 : f32
    %cst_4 = arith.constant 9.99999997E-7 : f32
    %8 = arith.cmpf olt, %7, %cst_4 : f32
    %9 = arith.extui %8 : i1 to i32
    %c0_i32 = arith.constant 0 : i32
    %10 = arith.cmpi ne, %9, %c0_i32 : i32
    scf.if %10 {
      %22 = arith.mulf %5, %5 : vector<8x64x32xf32>
      %23 = arith.mulf %22, %5 : vector<8x64x32xf32>
      %cst_13 = arith.constant dense<0.000000e+00> : vector<8x32xf32>
      %24 = vector.multi_reduction <add>, %23, %cst_13 [1] : vector<8x64x32xf32> to vector<8x32xf32>
      %cst_14 = arith.constant 6.400000e+01 : f32
      %25 = vector.broadcast %cst_14 : f32 to vector<8x32xf32>
      %26 = arith.divf %24, %25 : vector<8x32xf32>
      %c0_15 = arith.constant 0 : index
      %c0_16 = arith.constant 0 : index
      %27 = vector.load %arg5[%c0_15, %c0_16] : memref<8x32xf32, #tpu.memory_space<vmem>>, vector<8x32xf32>
      tpu.vector_store %arg5[%c0_15, %c0_16], %26 {strides = array<i32>} : memref<8x32xf32, #tpu.memory_space<vmem>>, vector<8x32xf32>,
    } else {
    }
    %true = arith.constant true
    %11 = arith.xori %8, %true : i1
    %12 = arith.extui %11 : i1 to i32
    %c0_i32_5 = arith.constant 0 : i32
    %13 = arith.cmpi ne, %12, %c0_i32_5 : i32
    scf.if %13 {
      %22 = math.log %5 : vector<8x64x32xf32>
      %23 = vector.broadcast %0 : f32 to vector<8x64x32xf32>
      %24 = arith.mulf %23, %22 : vector<8x64x32xf32>
      %25 = math.exp %24 : vector<8x64x32xf32>
      %cst_13 = arith.constant dense<0.000000e+00> : vector<8x32xf32>
      %26 = vector.multi_reduction <add>, %25, %cst_13 [1] : vector<8x64x32xf32> to vector<8x32xf32>
      %cst_14 = arith.constant 6.400000e+01 : f32
      %27 = vector.broadcast %cst_14 : f32 to vector<8x32xf32>
      %28 = arith.divf %26, %27 : vector<8x32xf32>
      %c0_15 = arith.constant 0 : index
      %c0_16 = arith.constant 0 : index
      %29 = vector.load %arg5[%c0_15, %c0_16] : memref<8x32xf32, #tpu.memory_space<vmem>>, vector<8x32xf32>
      tpu.vector_store %arg5[%c0_15, %c0_16], %28 {strides = array<i32>} : memref<8x32xf32, #tpu.memory_space<vmem>>, vector<8x32xf32>,
    } else {
    }
    %c0_6 = arith.constant 0 : index
    %c0_7 = arith.constant 0 : index
    %14 = vector.load %arg5[%c0_6, %c0_7] : memref<8x32xf32, #tpu.memory_space<vmem>>, vector<8x32xf32>
    %15 = math.log %14 : vector<8x32xf32>
    %16 = vector.broadcast %1 : f32 to vector<8x32xf32>
    %17 = arith.mulf %16, %15 : vector<8x32xf32>
    %18 = math.exp %17 : vector<8x32xf32>
    %c0_8 = arith.constant 0 : index
    %c0_9 = arith.constant 0 : index
    %19 = vector.load %arg3[%c0_8, %c0_9] : memref<32x128xf32, #tpu.memory_space<vmem>>, vector<32x128xf32>
    %cst_10 = arith.constant dense<0.000000e+00> : vector<8x128xf32>
    %20 = tpu.matmul %18, %19, %cst_10 {dimension_numbers = #tpu.dot_dimension_numbers<[1], [0], [0], [1], [0, 0, 1, 1], [], []>} : vector<8x32xf32>, vector<32x128xf32>, vector<8x128xf32> -> vector<8x128xf32>
    %c0_11 = arith.constant 0 : index
    %c0_12 = arith.constant 0 : index
    %21 = vector.load %arg4[%c0_11, %c0_12] : memref<8x128xf32, #tpu.memory_space<vmem>>, vector<8x128xf32>
    tpu.vector_store %arg4[%c0_11, %c0_12], %20 {strides = array<i32>} : memref<8x128xf32, #tpu.memory_space<vmem>>, vector<8x128xf32>,
    return
  }
  func.func @transform_0(%arg0: i32, %arg1: memref<2xf32, #tpu.memory_space<smem>>) -> (i32, i32, i32) {
    %c0_i32 = arith.constant 0 : i32
    %c0_i32_0 = arith.constant 0 : i32
    %c0_i32_1 = arith.constant 0 : i32
    return %arg0, %c0_i32, %c0_i32_0 : i32, i32, i32
  }
  func.func @transform_1(%arg0: i32, %arg1: memref<2xf32, #tpu.memory_space<smem>>) -> (i32, i32) {
    %c0_i32 = arith.constant 0 : i32
    %c0_i32_0 = arith.constant 0 : i32
    %c0_i32_1 = arith.constant 0 : i32
    return %c0_i32, %c0_i32_0 : i32, i32
  }
  func.func @transform_2(%arg0: i32, %arg1: memref<2xf32, #tpu.memory_space<smem>>) -> (i32, i32) {
    %c0_i32 = arith.constant 0 : i32
    %c0_i32_0 = arith.constant 0 : i32
    return %arg0, %c0_i32 : i32, i32
  }
}

</mosaic_0001>

<bundles_post_ra>
// kernel: tpu_custom_call.1
= control target key start
LH: loop header
LB: loop body
LE: loop exit
PB: predicated region body
PF: predicated region fallthrough
CT: control target
= control target key end

     0   :  { %s3604_s0 = inlined_call_operand.vmem [shape: f32[2], index: 0, kind: input, shape index: {}]   ;;  %s3605_s1 = inlined_call_operand.vmem [shape: bf16[16,64,32], index: 1, kind: input, shape index: {}]   ;;  %s3606_s2 = inlined_call_operand.vmem [shape: f32[32,128], index: 2, kind: input, shape index: {}]   ;;  %s3607_s3 = inlined_call_operand.hbm [shape: f32[16,128], index: 3, kind: output, shape index: {}]  }
   0x1   :  { %s8_s14 = sshll.u32 %s3604_s0, 4  ;;  %s9_s14 = int_to_ptr.vmem [resolvable:$true] %s8_s14 }
   0x2   :  { %s1862_s15 = scalar_lea.vmem %s9_s14, 16  ;;  %p1867_p1 = scmp.lt.s32.totalorder %s9_s14, %s9_s14 }
   0x3   :  { %p1863_p0 = scmp.ne.s32.totalorder %s9_s14, %s1862_s15  ;;  %p1868_p2 = scmp.lt.s32.totalorder %s1862_s15, %s1862_s15 }
   0x5   :  { %p1869_p3 = por %p1868_p2, %p1867_p1 }
   0x7   :  { %p1870_p4 = pnand %p1869_p3, %p1863_p0 }
   0x9   :  { %1873 = shalt.err (!%p1870_p4)  }
   0xa   :  { %s1938_s16 = smov [#allocation4]  }
   0xb   :  { %11 = dma.vmem_to_smem %s9_s14, 16, %s1938_s16, [#allocation3] }
   0xc   :  { %1916 = dma.done.wait [#allocation3], 16 }
   0xd   :  { %1917 = vsyncadd [#allocation3], 4294967280 }
   0xe   :  { %13 = sfence }
   0xf   :  { %14 = vsyncpa [#allocation6], 0 }
  0x10   :  { %16 = vsyncpa [#allocation6 + $0x1], 0  ;;  %s1965_s17 = smov 0   ;;  %s1967_s18 = smov 0  }
  0x11   :  { %s1969_s0 = smov 0   ;;  %s1971_s19 = smov 0  }
  0x12 LB: > { %s1986_s20 = sadd.s32 4294967295, %s1936_s19   ;;  %s1369_s21 = sadd.s32 4294967294, %s1936_s19   ;;  %s1936_s19 = sphi %s1971_s19, %s3938_s19   ;;  %s1932_s0 = sphi %s1969_s0, %s3937_s0   ;;  %s1928_s18 = sphi %s1967_s18, %s3936_s18   ;;  %s1924_s17 = sphi %s1965_s17, %s3935_s17  }
  0x13   : > { %s1990_s22 = sadd.s32 1, %s1936_s19   ;;  %s76_s23 = sadd.s32 1, %s1932_s0 }
  0x14   : > { %s73_s24 = ssub.s32 %s1936_s19, %s1990_s22  ;;  %p86_p5 = scmp.ne.s32.totalorder %s1932_s0, %s1928_s18 }
  0x15   : > { %p74_p6 = scmp.eq.s32.totalorder %s73_s24, 0  ;;  %p87_p7 = scmp.eq.s32.totalorder %s1986_s20, 1 }
  0x16   : > { %p92_p8 = scmp.ne.s32.totalorder %s1928_s18, %s1924_s17  ;;  %p93_p9 = scmp.eq.s32.totalorder %s1369_s21, 1 }
  0x17   : > { %s2001_s25 = scalar_select %p74_p6, %s1932_s0, %s76_s23  }
  0x18   : > { %p2003_p10 = por %p87_p7, %p86_p5  ;;  %p2007_p11 = por %p93_p9, %p92_p8 }
  0x19   : > { %p1372_p12 = scmp.ge.s32.totalorder %s1936_s19, 1  ;;  %p124_p13 = scmp.lt.s32.totalorder %s1936_s19, 3 }
  0x1b   : > { %p125_p0 = pnand %p1372_p12, %p124_p13 }
  0x1d   : > { %128 = sbr.rel (%p125_p0) target bundleno = 606 (0x25e), region = 28 }
  0x22   : > { %s144_s28 = sand.u32 1, %s1928_s18   ;;  %s1374_s29 = sshll.u32 %s1986_s20, 3 }
  0x23   : > { %s2017_s30 = sshll.u32 %s144_s28, 3  ;;  %p148_p1 = scmp.lt.s32.totalorder %s1374_s29, 15 }
  0x24   : > { %s2019_s4 = sld [smem:[#allocation4]]  ;;  %s146_s12 = scalar_lea.vmem [#allocation5], %s2017_s30 }
  0x25   : > { %s3940_s29 = smov (!%p148_p1, %s1374_s29), 15  ;;  %s2021_s5 = sld [smem:[#allocation4 + $0x1]] }
  0x26   : > { %s1384_s6 = sshll.u32 %s3940_s29, 5 }
  0x27   : > { %s2026_s9 = scalar_lea.vmem %s3605_s1, %s1384_s6 }
  0x28   : > { %v2030_v0 = vld [vmem:[%s2026_s9] sm:$0xff]   ;;  %v2033_v1 = vld [vmem:[%s2026_s9 + $0x8] sm:$0xff]   ;;  %v2036_v2 = vld [vmem:[%s2026_s9 + $0x10] sm:$0xff]  }
  0x29   : > { %v2041_v3 = vld [vmem:[%s2026_s9 + $0x18] sm:$0xff]   ;;  %v2044_v4 = vld [vmem:[%s2026_s9 + $0x20] sm:$0xff]   ;;  %v1387_v5 = vunpack.c.l.bf16 %v2030_v0  ;;  %v1388_v6 = vunpack.c.h.bf16 %v2030_v0  ;;  %v2050_v7 = vld [vmem:[%s2026_s9 + $0x28] sm:$0xff]   ;;  %v1391_v9 = vunpack.c.l.bf16 %v2033_v1  ;;  %v1392_v10 = vunpack.c.h.bf16 %v2033_v1 }
  0x2a   : > { %s1378_s10 = sadd.f32 -3.0, %s2019_s4  ;;  %v2053_v8 = vld [vmem:[%s2026_s9 + $0x30] sm:$0xff]   ;;  %v1395_v11 = vunpack.c.l.bf16 %v2036_v2  ;;  %v1396_v12 = vunpack.c.h.bf16 %v2036_v2  ;;  %v2060_v13 = vld [vmem:[%s2026_s9 + $0x38] sm:$0xff]   ;;  %v2063_v14 = vld [vmem:[%s2026_s9 + $0x40] sm:$0xff]   ;;  %v1399_v15 = vunpack.c.l.bf16 %v2041_v3  ;;  %v1400_v16 = vunpack.c.h.bf16 %v2041_v3 }
  0x2b   : > { %v1403_v17 = vunpack.c.l.bf16 %v2044_v4  ;;  %v1404_v18 = vunpack.c.h.bf16 %v2044_v4  ;;  %v2070_v19 = vld [vmem:[%s2026_s9 + $0x48] sm:$0xff]   ;;  %v2073_v20 = vld [vmem:[%s2026_s9 + $0x50] sm:$0xff]   ;;  %v1407_v21 = vunpack.c.l.bf16 %v2050_v7  ;;  %v1408_v22 = vunpack.c.h.bf16 %v2050_v7  ;;  %v2080_v25 = vld [vmem:[%s2026_s9 + $0x58] sm:$0xff]  }
  0x2c   : > { %s2038_s11 = sand.u32 2147483647, %s1378_s10  ;;  %v1411_v23 = vunpack.c.l.bf16 %v2053_v8  ;;  %v1412_v24 = vunpack.c.h.bf16 %v2053_v8  ;;  %v2083_v26 = vld [vmem:[%s2026_s9 + $0x60] sm:$0xff]   ;;  %v1415_v27 = vunpack.c.l.bf16 %v2060_v13  ;;  %v1416_v28 = vunpack.c.h.bf16 %v2060_v13  ;;  %v2090_v31 = vld [vmem:[%s2026_s9 + $0x68] sm:$0xff]   ;;  %v2093_v32 = vld [vmem:[%s2026_s9 + $0x70] sm:$0xff]  }
  0x2d   : > { %p350_p2 = scmp.lt.f32.partialorder %s2038_s11, 1e-06  ;;  %v1419_v29 = vunpack.c.l.bf16 %v2063_v14  ;;  %v1420_v30 = vunpack.c.h.bf16 %v2063_v14  ;;  %v1423_v33 = vunpack.c.l.bf16 %v2070_v19  ;;  %v1424_v34 = vunpack.c.h.bf16 %v2070_v19  ;;  %v2100_v37 = vld [vmem:[%s2026_s9 + $0x78] sm:$0xff]   ;;  %v2103_v38 = vld [vmem:[%s2026_s9 + $0x80] sm:$0xff]   ;;  %v2110_v43 = vld [vmem:[%s2026_s9 + $0x88] sm:$0xff]  }
  0x2e   : > { %v1427_v35 = vunpack.c.l.bf16 %v2073_v20  ;;  %v1428_v36 = vunpack.c.h.bf16 %v2073_v20  ;;  %v1431_v39 = vunpack.c.l.bf16 %v2080_v25  ;;  %v1432_v40 = vunpack.c.h.bf16 %v2080_v25  ;;  %v2113_v44 = vld [vmem:[%s2026_s9 + $0x90] sm:$0xff]   ;;  %v2120_v49 = vld [vmem:[%s2026_s9 + $0x98] sm:$0xff]   ;;  %v2123_v50 = vld [vmem:[%s2026_s9 + $0xa0] sm:$0xff]  }
  0x2f   : > { %v1435_v41 = vunpack.c.l.bf16 %v2083_v26  ;;  %v1436_v42 = vunpack.c.h.bf16 %v2083_v26  ;;  %v1439_v45 = vunpack.c.l.bf16 %v2090_v31  ;;  %v1440_v46 = vunpack.c.h.bf16 %v2090_v31  ;;  %v2130_v55 = vld [vmem:[%s2026_s9 + $0xa8] sm:$0xff]   ;;  %v2133_v56 = vld [vmem:[%s2026_s9 + $0xb0] sm:$0xff]   ;;  %v2140_v61 = vld [vmem:[%s2026_s9 + $0xb8] sm:$0xff]  }
  0x30   : > { %v1443_v47 = vunpack.c.l.bf16 %v2093_v32  ;;  %v1444_v48 = vunpack.c.h.bf16 %v2093_v32  ;;  %v2151_v60 = vld [vmem:[%s2026_s9 + $0xc0] sm:$0xff]   ;;  %v2154_v51 = vld [vmem:[%s2026_s9 + $0xc8] sm:$0xff]   ;;  %v2159_v54 = vmax.f32 %v1387_v5, 1e-06  ;;  %v2163_v52 = vmax.f32 %v1388_v6, 1e-06 }
  0x31   : > { %v2167_v58 = vmax.f32 %v1391_v9, 1e-06  ;;  %v2171_v57 = vld [vmem:[%s2026_s9 + $0xd0] sm:$0xff]   ;;  %v2175_v53 = vmax.f32 %v1392_v10, 1e-06  ;;  %v1483_v6 = vunpack.c.l.bf16 %v2151_v60  ;;  %v2200_v2 = vld [vmem:[%s2026_s9 + $0xd8] sm:$0xff]   ;;  %v3708_v31 = vunpack.c.l.bf16 %v2103_v38 }
  0x32   : > { %3674 = vst [vmem:[#allocation9_spill] sm:$0xff] %v2159_v54  ;;  %3675 = vst [vmem:[#allocation10_spill] sm:$0xff] %v2163_v52  ;;  %v2179_v5 = vmax.f32 %v1395_v11, 1e-06  ;;  %v2183_v0 = vmax.f32 %v1396_v12, 1e-06  ;;  %v1484_v11 = vunpack.c.h.bf16 %v2151_v60  ;;  %v3710_v59 = vunpack.c.h.bf16 %v2103_v38 }
  0x33   : > { %3676 = vst [vmem:[#allocation11_spill] sm:$0xff] %v2167_v58  ;;  %3677 = vst [vmem:[#allocation12_spill] sm:$0xff] %v2175_v53  ;;  %v2188_v9 = vmax.f32 %v1399_v15, 1e-06  ;;  %v2192_v1 = vmax.f32 %v1400_v16, 1e-06  ;;  %v1487_v16 = vunpack.c.l.bf16 %v2154_v51  ;;  %v3720_v38 = vunpack.c.l.bf16 %v2120_v49 }
  0x34   : > { %3678 = vst [vmem:[#allocation13_spill] sm:$0xff] %v2179_v5  ;;  %3679 = vst [vmem:[#allocation14_spill] sm:$0xff] %v2183_v0  ;;  %v2196_v10 = vmax.f32 %v1403_v17, 1e-06  ;;  %v2204_v12 = vmax.f32 %v1404_v18, 1e-06 }
  0x35   : > { %3680 = vst [vmem:[#allocation15_spill] sm:$0xff] %v2188_v9  ;;  %3681 = vst [vmem:[#allocation16_spill] sm:$0xff] %v2192_v1  ;;  %v2208_v15 = vmax.f32 %v1407_v21, 1e-06  ;;  %v2212_v3 = vmax.f32 %v1408_v22, 1e-06  ;;  %v1488_v21 = vunpack.c.h.bf16 %v2154_v51  ;;  %v3706_v51 = vunpack.c.h.bf16 %v2100_v37 }
  0x36   : > { %3682 = vst [vmem:[#allocation17_spill] sm:$0xff] %v2196_v10  ;;  %3683 = vst [vmem:[#allocation18_spill] sm:$0xff] %v2204_v12  ;;  %v2217_v17 = vmax.f32 %v1411_v23, 1e-06  ;;  %v2221_v4 = vmax.f32 %v1412_v24, 1e-06  ;;  %v1491_v23 = vunpack.c.l.bf16 %v2171_v57 }
  0x37   : > { %3684 = vst [vmem:[#allocation19_spill] sm:$0xff] %v2208_v15  ;;  %3685 = vst [vmem:[#allocation20_spill] sm:$0xff] %v2212_v3  ;;  %v2225_v18 = vmax.f32 %v1415_v27, 1e-06  ;;  %v1540_v7 = vld [vmem:[%s2026_s9 + $0xe0] sm:$0xff]   ;;  %v1541_v14 = vld [vmem:[%s2026_s9 + $0xe8] sm:$0xff]  }
  0x38   : > { %3686 = vst [vmem:[#allocation21_spill] sm:$0xff] %v2217_v17  ;;  %3687 = vst [vmem:[#allocation22_spill] sm:$0xff] %v2221_v4  ;;  %v2231_v22 = vmax.f32 %v1416_v28, 1e-06  ;;  %v2235_v60 = vmax.f32 %v1419_v29, 1e-06  ;;  %v1492_v28 = vunpack.c.h.bf16 %v2171_v57 }
  0x39   : > { %3688 = vst [vmem:[#allocation23_spill] sm:$0xff] %v2225_v18  ;;  %v2239_v8 = vmax.f32 %v1420_v30, 1e-06  ;;  %v2244_v24 = vmax.f32 %v1423_v33, 1e-06  ;;  %v1495_v33 = vunpack.c.l.bf16 %v2200_v2  ;;  %v1542_v25 = vld [vmem:[%s2026_s9 + $0xf0] sm:$0xff]  }
  0x3a   : > { %3689 = vst [vmem:[#allocation24_spill] sm:$0xff] %v2231_v22  ;;  %3690 = vst [vmem:[#allocation25_spill] sm:$0xff] %v2235_v60  ;;  %v2248_v13 = vmax.f32 %v1424_v34, 1e-06  ;;  %v2252_v27 = vmax.f32 %v1427_v35, 1e-06 }
  0x3b   : > { %3691 = vst [vmem:[#allocation26_spill] sm:$0xff] %v2239_v8  ;;  %3692 = vst [vmem:[#allocation27_spill] sm:$0xff] %v2244_v24  ;;  %v2258_v29 = vmax.f32 %v1428_v36, 1e-06  ;;  %v2262_v30 = vmax.f32 %v1431_v39, 1e-06  ;;  %v1496_v36 = vunpack.c.h.bf16 %v2200_v2  ;;  %v1500_v2 = vunpack.c.h.bf16 %v1540_v7 }
  0x3c   : > { %3693 = vst [vmem:[#allocation28_spill] sm:$0xff] %v2248_v13  ;;  %3694 = vst [vmem:[#allocation29_spill] sm:$0xff] %v2252_v27  ;;  %v2266_v19 = vmax.f32 %v1432_v40, 1e-06  ;;  %v2271_v34 = vmax.f32 %v1435_v41, 1e-06  ;;  %v1499_v41 = vunpack.c.l.bf16 %v1540_v7  ;;  %v3718_v7 = vunpack.c.h.bf16 %v2113_v44 }
  0x3d   : > { %3695 = vst [vmem:[#allocation30_spill] sm:$0xff] %v2258_v29  ;;  %3696 = vst [vmem:[#allocation31_spill] sm:$0xff] %v2262_v30  ;;  %v2275_v20 = vmax.f32 %v1436_v42, 1e-06  ;;  %v2279_v35 = vmax.f32 %v1439_v45, 1e-06  ;;  %v3704_v42 = vunpack.c.l.bf16 %v2100_v37  ;;  %v1503_v37 = vunpack.c.l.bf16 %v1541_v14 }
  0x3e   : > { %3697 = vst [vmem:[#allocation32_spill] sm:$0xff] %v2266_v19  ;;  %3698 = vst [vmem:[#allocation33_spill] sm:$0xff] %v2271_v34  ;;  %v2285_v39 = vmax.f32 %v1440_v46, 1e-06  ;;  %v2289_v40 = vmax.f32 %v1443_v47, 1e-06 }
  0x3f   : > { %3699 = vst [vmem:[#allocation34_spill] sm:$0xff] %v2275_v20  ;;  %3700 = vst [vmem:[#allocation35_spill] sm:$0xff] %v2279_v35  ;;  %v2293_v26 = vmax.f32 %v1444_v48, 1e-06  ;;  %v2297_v45 = vmax.f32 %v3704_v42, 1e-06  ;;  %v3712_v48 = vunpack.c.l.bf16 %v2110_v43  ;;  %v3714_v42 = vunpack.c.h.bf16 %v2110_v43 }
  0x40   : > { %3701 = vst [vmem:[#allocation36_spill] sm:$0xff] %v2285_v39  ;;  %3702 = vst [vmem:[#allocation37_spill] sm:$0xff] %v2289_v40  ;;  %v2301_v57 = vmax.f32 %v3706_v51, 1e-06  ;;  %v2305_v46 = vmax.f32 %v3708_v31, 1e-06  ;;  %v3716_v51 = vunpack.c.l.bf16 %v2113_v44  ;;  %v3724_v43 = vunpack.c.l.bf16 %v2123_v50 }
  0x41   : > { %3703 = vst [vmem:[#allocation38_spill] sm:$0xff] %v2293_v26  ;;  %3705 = vst [vmem:[#allocation39_spill] sm:$0xff] %v2297_v45  ;;  %v1543_v47 = vld [vmem:[%s2026_s9 + $0xf8] sm:$0xff]   ;;  %v2310_v32 = vmax.f32 %v3710_v59, 1e-06  ;;  %v1507_v44 = vunpack.c.l.bf16 %v1542_v25 }
  0x42   : > { %3707 = vst [vmem:[#allocation40_spill] sm:$0xff] %v2301_v57  ;;  %3709 = vst [vmem:[#allocation41_spill] sm:$0xff] %v2305_v46  ;;  %v2314_v62 = vmax.f32 %v3712_v48, 1e-06  ;;  %v2318_v63 = vmax.f32 %v3714_v42, 1e-06  ;;  %v3722_v48 = vunpack.c.h.bf16 %v2120_v49  ;;  %v3732_v49 = vunpack.c.l.bf16 %v2133_v56 }
  0x43   : > { %3711 = vst [vmem:[#allocation42_spill] sm:$0xff] %v2310_v32  ;;  %v2322_v57 = vmax.f32 %v3716_v51, 1e-06  ;;  %v2326_v31 = vmax.f32 %v3718_v7, 1e-06  ;;  %v1504_v32 = vunpack.c.h.bf16 %v1541_v14  ;;  %v3726_v51 = vunpack.c.h.bf16 %v2123_v50 }
  0x44   : > { %3713 = vst [vmem:[#allocation43_spill] sm:$0xff] %v2314_v62  ;;  %3715 = vst [vmem:[#allocation44_spill] sm:$0xff] %v2318_v63  ;;  %v2330_v59 = vmax.f32 %v3720_v38, 1e-06  ;;  %v2334_v62 = vmax.f32 %v3722_v48, 1e-06  ;;  %v3728_v7 = vunpack.c.l.bf16 %v2130_v55  ;;  %v3730_v38 = vunpack.c.h.bf16 %v2130_v55 }
  0x45   : > { %3717 = vst [vmem:[#allocation45_spill] sm:$0xff] %v2322_v57  ;;  %3719 = vst [vmem:[#allocation46_spill] sm:$0xff] %v2326_v31  ;;  %v2338_v42 = vmax.f32 %v3724_v43, 1e-06  ;;  %v2342_v57 = vmax.f32 %v3726_v51, 1e-06  ;;  %v3734_v43 = vunpack.c.h.bf16 %v2133_v56  ;;  %v3736_v50 = vunpack.c.l.bf16 %v2140_v61 }
  0x46   : > { %3721 = vst [vmem:[#allocation47_spill] sm:$0xff] %v2330_v59  ;;  %3723 = vst [vmem:[#allocation48_spill] sm:$0xff] %v2334_v62  ;;  %v2346_v31 = vmax.f32 %v3728_v7, 1e-06  ;;  %v2350_v14 = vmax.f32 %v3730_v38, 1e-06  ;;  %v1508_v62 = vunpack.c.h.bf16 %v1542_v25  ;;  %v3738_v7 = vunpack.c.h.bf16 %v2140_v61 }
  0x47   : > { %3725 = vst [vmem:[#allocation49_spill] sm:$0xff] %v2338_v42  ;;  %3727 = vst [vmem:[#allocation50_spill] sm:$0xff] %v2342_v57  ;;  %v2354_v48 = vmax.f32 %v3732_v49, 1e-06  ;;  %v2358_v42 = vmax.f32 %v3734_v43, 1e-06  ;;  %v1511_v55 = vunpack.c.l.bf16 %v1543_v47  ;;  %v1512_v25 = vunpack.c.h.bf16 %v1543_v47 }
  0x48   : > { %3729 = vst [vmem:[#allocation51_spill] sm:$0xff] %v2346_v31  ;;  %3731 = vst [vmem:[#allocation52_spill] sm:$0xff] %v2350_v14  ;;  %v2362_v51 = vmax.f32 %v3736_v50, 1e-06  ;;  %v2366_v31 = vmax.f32 %v3738_v7, 1e-06 }
  0x49   : > { %3733 = vst [vmem:[#allocation53_spill] sm:$0xff] %v2354_v48  ;;  %3735 = vst [vmem:[#allocation54_spill] sm:$0xff] %v2358_v42  ;;  %v2368_v38 = vmax.f32 %v1483_v6, 1e-06  ;;  %v2370_v14 = vmax.f32 %v1484_v11, 1e-06 }
  0x4a   : > { %3737 = vst [vmem:[#allocation55_spill] sm:$0xff] %v2362_v51  ;;  %3739 = vst [vmem:[#allocation56_spill] sm:$0xff] %v2366_v31  ;;  %v2372_v49 = vmax.f32 %v1487_v16, 1e-06  ;;  %v2374_v56 = vmax.f32 %v1488_v21, 1e-06 }
  0x4b   : > { %3740 = vst [vmem:[#allocation57_spill] sm:$0xff] %v2368_v38  ;;  %3741 = vst [vmem:[#allocation58_spill] sm:$0xff] %v2370_v14  ;;  %v2376_v43 = vmax.f32 %v1491_v23, 1e-06  ;;  %v2378_v42 = vmax.f32 %v1492_v28, 1e-06 }
  0x4c   : > { %3742 = vst [vmem:[#allocation59_spill] sm:$0xff] %v2372_v49  ;;  %3743 = vst [vmem:[#allocation60_spill] sm:$0xff] %v2374_v56  ;;  %v2380_v50 = vmax.f32 %v1495_v33, 1e-06  ;;  %v2382_v61 = vmax.f32 %v1496_v36, 1e-06 }
  0x4d   : > { %3744 = vst [vmem:[#allocation61_spill] sm:$0xff] %v2376_v43  ;;  %3745 = vst [vmem:[#allocation62_spill] sm:$0xff] %v2378_v42  ;;  %v2384_v7 = vmax.f32 %v1499_v41, 1e-06  ;;  %v2386_v6 = vmax.f32 %v1500_v2, 1e-06 }
  0x4e   : > { %3746 = vst [vmem:[#allocation63_spill] sm:$0xff] %v2380_v50  ;;  %3747 = vst [vmem:[#allocation64_spill] sm:$0xff] %v2382_v61  ;;  %v2388_v11 = vmax.f32 %v1503_v37, 1e-06  ;;  %v2390_v14 = vmax.f32 %v1504_v32, 1e-06 }
  0x4f   : > { %3748 = vst [vmem:[#allocation65_spill] sm:$0xff] %v2384_v7  ;;  %3749 = vst [vmem:[#allocation66_spill] sm:$0xff] %v2386_v6  ;;  %v2392_v16 = vmax.f32 %v1507_v44, 1e-06  ;;  %v2394_v21 = vmax.f32 %v1508_v62, 1e-06 }
  0x50   : > { %3750 = vst [vmem:[#allocation67_spill] sm:$0xff] %v2388_v11  ;;  %3751 = vst [vmem:[#allocation68_spill] sm:$0xff] %v2390_v14  ;;  %v2396_v23 = vmax.f32 %v1511_v55, 1e-06  ;;  %v2398_v28 = vmax.f32 %v1512_v25, 1e-06 }
  0x51   : > { %3752 = vst [vmem:[#allocation69_spill] sm:$0xff] %v2392_v16  ;;  %3753 = vst [vmem:[#allocation70_spill] sm:$0xff] %v2394_v21  ;;  %353 = sbr.rel (!%p350_p2) target bundleno = 186 (0xba), region = 32 }
  0x52   : > { %3754 = vst [vmem:[#allocation71_spill] sm:$0xff] %v2396_v23  ;;  %3755 = vst [vmem:[#allocation72_spill] sm:$0xff] %v2398_v28 }
  0x56   : > { %v2405_v33 = vmul.f32 %v2159_v54, %v2159_v54  ;;  %v2409_v36 = vmul.f32 %v2163_v52, %v2163_v52  ;;  %v2413_v62 = vmul.f32 %v2167_v58, %v2167_v58  ;;  %v2417_v41 = vmul.f32 %v2175_v53, %v2175_v53 }
  0x57   : > { %v2421_v2 = vmul.f32 %v2179_v5, %v2179_v5  ;;  %v2425_v47 = vmul.f32 %v2183_v0, %v2183_v0  ;;  %v2429_v32 = vmul.f32 %v2188_v9, %v2188_v9  ;;  %v2433_v37 = vmul.f32 %v2192_v1, %v2192_v1 }
  0x58   : > { %v2437_v44 = vmul.f32 %v2196_v10, %v2196_v10  ;;  %v2441_v55 = vmul.f32 %v2204_v12, %v2204_v12  ;;  %v2445_v25 = vmul.f32 %v2208_v15, %v2208_v15  ;;  %v2449_v9 = vmul.f32 %v2212_v3, %v2212_v3 }
  0x59   : > { %v2453_v1 = vmul.f32 %v2217_v17, %v2217_v17  ;;  %v2457_v10 = vmul.f32 %v2221_v4, %v2221_v4  ;;  %v2461_v12 = vmul.f32 %v2225_v18, %v2225_v18  ;;  %v2465_v15 = vmul.f32 %v2231_v22, %v2231_v22 }
  0x5a   : > { %v2469_v3 = vmul.f32 %v2235_v60, %v2235_v60  ;;  %v2473_v17 = vmul.f32 %v2239_v8, %v2239_v8  ;;  %v2477_v4 = vmul.f32 %v2244_v24, %v2244_v24  ;;  %v2481_v18 = vmul.f32 %v2248_v13, %v2248_v13 }
  0x5b   : > { %v2485_v22 = vmul.f32 %v2252_v27, %v2252_v27  ;;  %v2489_v60 = vmul.f32 %v2258_v29, %v2258_v29  ;;  %v2493_v8 = vmul.f32 %v2262_v30, %v2262_v30  ;;  %v2497_v24 = vmul.f32 %v2266_v19, %v2266_v19 }
  0x5c   : > { %v2501_v13 = vmul.f32 %v2271_v34, %v2271_v34  ;;  %v2505_v27 = vmul.f32 %v2275_v20, %v2275_v20  ;;  %v2509_v29 = vmul.f32 %v2279_v35, %v2279_v35  ;;  %v2513_v30 = vmul.f32 %v2285_v39, %v2285_v39 }
  0x5d   : > { %v2517_v19 = vmul.f32 %v2289_v40, %v2289_v40  ;;  %v2521_v34 = vmul.f32 %v2293_v26, %v2293_v26  ;;  %v2525_v20 = vmul.f32 %v2297_v45, %v2297_v45  ;;  %v2533_v39 = vmul.f32 %v2305_v46, %v2305_v46 }
  0x5e   : > { %3756 = vst [vmem:[#allocation73_spill] sm:$0xff] %v2505_v27  ;;  %3757 = vst [vmem:[#allocation74_spill] sm:$0xff] %v2513_v30  ;;  %v3760_v27 = vld [vmem:[#allocation40_spill] sm:$0xff]  ;;  %v3762_v30 = vld [vmem:[#allocation42_spill] sm:$0xff]  ;;  %v2545_v45 = vmul.f32 %v2318_v63, %v2318_v63  ;;  %vm482_vm0 = vcmask 261120   ;;  %vm668_vm1 = vcmask 1041409  }
  0x5f   : > { %3758 = vst [vmem:[#allocation75_spill] sm:$0xff] %v2517_v19  ;;  %3759 = vst [vmem:[#allocation76_spill] sm:$0xff] %v2525_v20  ;;  %v2529_v35 = vmul.f32 %v3760_v27, %v3760_v27  ;;  %v2537_v40 = vmul.f32 %v3762_v30, %v3762_v30  ;;  %v3764_v19 = vld [vmem:[#allocation43_spill] sm:$0xff]  ;;  %v3766_v20 = vld [vmem:[#allocation45_spill] sm:$0xff]  ;;  %v2557_v30 = vmul.f32 %v2330_v59, %v2330_v59  ;;  %vm670_vm2 = vcmask 1042434  }
  0x60   : > { %v2541_v26 = vmul.f32 %v3764_v19, %v3764_v19  ;;  %v2549_v27 = vmul.f32 %v3766_v20, %v3766_v20  ;;  %v2569_v20 = vmul.f32 %v2342_v57, %v2342_v57  ;;  %v2589_v57 = vmul.f32 %v2362_v51, %v2362_v51 }
  0x61   : > { %3761 = vst [vmem:[#allocation77_spill] sm:$0xff] %v2529_v35  ;;  %3763 = vst [vmem:[#allocation78_spill] sm:$0xff] %v2537_v40  ;;  %v3768_v35 = vld [vmem:[#allocation46_spill] sm:$0xff]  ;;  %v3770_v40 = vld [vmem:[#allocation48_spill] sm:$0xff]  ;;  %v2609_v51 = vmul.f32 %v2374_v56, %v2374_v56  ;;  %v2629_v56 = vmul.f32 %v2384_v7, %v2384_v7  ;;  %v2649_v7 = vmul.f32 %v2394_v21, %v2394_v21  ;;  %vm672_vm3 = vcmask 1043459  }
  0x62   : > { %3765 = vst [vmem:[#allocation79_spill] sm:$0xff] %v2541_v26  ;;  %3767 = vst [vmem:[#allocation80_spill] sm:$0xff] %v2549_v27  ;;  %v2553_v46 = vmul.f32 %v3768_v35, %v3768_v35  ;;  %v2561_v19 = vmul.f32 %v3770_v40, %v3770_v40  ;;  %v3772_v26 = vld [vmem:[#allocation49_spill] sm:$0xff]  ;;  %v3773_v27 = vld [vmem:[#allocation51_spill] sm:$0xff]  ;;  %v2581_v40 = vmul.f32 %v2354_v48, %v2354_v48  ;;  %vm674_vm4 = vcmask 1044484  }
  0x63   : > { %v2565_v63 = vmul.f32 %v3772_v26, %v3772_v26  ;;  %v2573_v35 = vmul.f32 %v3773_v27, %v3773_v27  ;;  %v2593_v27 = vmul.f32 %v2366_v31, %v2366_v31  ;;  %v2613_v31 = vmul.f32 %v2376_v43, %v2376_v43  ;;  %3780 = vst [vmem:[#allocation86_spill] sm:$0xff] %v2649_v7 }
  0x64   : > { %3769 = vst [vmem:[#allocation81_spill] sm:$0xff] %v2553_v46  ;;  %3771 = vst [vmem:[#allocation82_spill] sm:$0xff] %v2561_v19  ;;  %v3774_v46 = vld [vmem:[#allocation52_spill] sm:$0xff]  ;;  %v3776_v19 = vld [vmem:[#allocation54_spill] sm:$0xff]  ;;  %v2633_v43 = vmul.f32 %v2386_v6, %v2386_v6  ;;  %v2653_v6 = vmul.f32 %v2396_v23, %v2396_v23  ;;  %v421_v7 = vmul.f32 %v2417_v41, %v2175_v53  ;;  %vm676_vm5 = vcmask 1045509  }
  0x65   : > { %v2577_v59 = vmul.f32 %v3774_v46, %v3774_v46  ;;  %v2585_v26 = vmul.f32 %v3776_v19, %v3776_v19  ;;  %v2597_v46 = vmul.f32 %v2368_v38, %v2368_v38  ;;  %v2605_v19 = vmul.f32 %v2372_v49, %v2372_v49  ;;  %v3786_v41 = vld [vmem:[#allocation18_spill] sm:$0xff] }
  0x66   : > { %v2617_v38 = vmul.f32 %v2378_v42, %v2378_v42  ;;  %v2625_v49 = vmul.f32 %v2382_v61, %v2382_v61  ;;  %v2637_v42 = vmul.f32 %v2388_v11, %v2388_v11  ;;  %v2645_v61 = vmul.f32 %v2392_v16, %v2392_v16  ;;  %3781 = vst [vmem:[#allocation87_spill] sm:$0xff] %v2653_v6  ;;  %v3809_v6 = vld [vmem:[#allocation75_spill] sm:$0xff]  ;;  %v3814_v21 = vld [vmem:[#allocation76_spill] sm:$0xff] }
  0x67   : > { %3775 = vst [vmem:[#allocation83_spill] sm:$0xff] %v2577_v59  ;;  %v3777_v59 = vld [vmem:[#allocation58_spill] sm:$0xff]  ;;  %v2657_v11 = vmul.f32 %v2398_v28, %v2398_v28  ;;  %v2669_v23 = vmul.f32 %v2421_v2, %v2179_v5  ;;  %v2673_v28 = vmul.f32 %v2425_v47, %v2183_v0  ;;  %v427_v53 = vmul.f32 %v2441_v55, %v3786_v41  ;;  %v3787_v2 = vld [vmem:[#allocation19_spill] sm:$0xff]  ;;  %v3789_v0 = vld [vmem:[#allocation21_spill] sm:$0xff] }
  0x68   : > { %v2601_v48 = vmul.f32 %v3777_v59, %v3777_v59  ;;  %v2621_v59 = vmul.f32 %v2380_v50, %v2380_v50  ;;  %v2641_v50 = vmul.f32 %v2390_v14, %v2390_v14  ;;  %3779 = vst [vmem:[#allocation85_spill] sm:$0xff] %v2645_v61  ;;  %v418_v14 = vmul.f32 %v2405_v33, %v2159_v54  ;;  %v3784_v54 = vld [vmem:[#allocation16_spill] sm:$0xff]  ;;  %v3817_v16 = vld [vmem:[#allocation77_spill] sm:$0xff] }
  0x69   : > { %3782 = vst [vmem:[#allocation88_spill] sm:$0xff] %v2657_v11  ;;  %v420_v61 = vmul.f32 %v2413_v62, %v2167_v58  ;;  %v3783_v11 = vld [vmem:[#allocation15_spill] sm:$0xff]  ;;  %v3785_v62 = vld [vmem:[#allocation17_spill] sm:$0xff]  ;;  %v428_v5 = vmul.f32 %v2445_v25, %v3787_v2  ;;  %v3792_v55 = vld [vmem:[#allocation24_spill] sm:$0xff]  ;;  %vm678_vm6 = vcmask 1046534   ;;  %vm680_vm7 = vcmask 1047559  }
  0x6a   : > { %3778 = vst [vmem:[#allocation84_spill] sm:$0xff] %v2641_v50  ;;  %v419_v50 = vmul.f32 %v2409_v36, %v2163_v52  ;;  %v2677_v33 = vmul.f32 %v2429_v32, %v3783_v11  ;;  %v2681_v36 = vmul.f32 %v2433_v37, %v3784_v54  ;;  %v426_v58 = vmul.f32 %v2437_v44, %v3785_v62  ;;  %v3788_v52 = vld [vmem:[#allocation20_spill] sm:$0xff]  ;;  %v3790_v32 = vld [vmem:[#allocation22_spill] sm:$0xff]  ;;  %v3791_v37 = vld [vmem:[#allocation23_spill] sm:$0xff] }
  0x6b   : > { %v2691_v47 = vmul.f32 %v2449_v9, %v3788_v52  ;;  %v2695_v11 = vmul.f32 %v2453_v1, %v3789_v0  ;;  %v2699_v54 = vmul.f32 %v2457_v10, %v3790_v32  ;;  %v2703_v44 = vmul.f32 %v2461_v12, %v3791_v37  ;;  %v3793_v25 = vld [vmem:[#allocation25_spill] sm:$0xff]  ;;  %v3794_v9 = vld [vmem:[#allocation26_spill] sm:$0xff]  ;;  %v3795_v0 = vld [vmem:[#allocation27_spill] sm:$0xff] }
  0x6c   : > { %v2707_v62 = vmul.f32 %v2465_v15, %v3792_v55  ;;  %v434_v52 = vmul.f32 %v2469_v3, %v3793_v25  ;;  %v435_v41 = vmul.f32 %v2473_v17, %v3794_v9  ;;  %v436_v1 = vmul.f32 %v2477_v4, %v3795_v0  ;;  %v3796_v2 = vld [vmem:[#allocation28_spill] sm:$0xff]  ;;  %v3797_v32 = vld [vmem:[#allocation29_spill] sm:$0xff]  ;;  %v3798_v37 = vld [vmem:[#allocation30_spill] sm:$0xff] }
  0x6d   : > { %v2717_v10 = vmul.f32 %v2481_v18, %v3796_v2  ;;  %v2721_v12 = vmul.f32 %v2485_v22, %v3797_v32  ;;  %v2725_v15 = vmul.f32 %v2489_v60, %v3798_v37  ;;  %v3799_v55 = vld [vmem:[#allocation31_spill] sm:$0xff]  ;;  %v3800_v17 = vld [vmem:[#allocation32_spill] sm:$0xff]  ;;  %v3802_v4 = vld [vmem:[#allocation33_spill] sm:$0xff] }
  0x6e   : > { %v2729_v3 = vmul.f32 %v2493_v8, %v3799_v55  ;;  %v2733_v25 = vmul.f32 %v2497_v24, %v3800_v17  ;;  %v2737_v18 = vmul.f32 %v2501_v13, %v3802_v4  ;;  %v3803_v9 = vld [vmem:[#allocation34_spill] sm:$0xff]  ;;  %v3804_v0 = vld [vmem:[#allocation73_spill] sm:$0xff]  ;;  %v3805_v2 = vld [vmem:[#allocation35_spill] sm:$0xff] }
  0x6f   : > { %v2741_v22 = vmul.f32 %v3804_v0, %v3803_v9  ;;  %v2745_v60 = vmul.f32 %v2509_v29, %v3805_v2  ;;  %v3806_v32 = vld [vmem:[#allocation36_spill] sm:$0xff]  ;;  %v3807_v37 = vld [vmem:[#allocation74_spill] sm:$0xff]  ;;  %v3808_v55 = vld [vmem:[#allocation37_spill] sm:$0xff] }
  0x70   : > { %3801 = vst [vmem:[#allocation89_spill] sm:$0xff] %v2733_v25  ;;  %v2749_v8 = vmul.f32 %v3807_v37, %v3806_v32  ;;  %v2753_v24 = vmul.f32 %v3809_v6, %v3808_v55  ;;  %v3811_v17 = vld [vmem:[#allocation38_spill] sm:$0xff]  ;;  %v3813_v4 = vld [vmem:[#allocation39_spill] sm:$0xff]  ;;  %v3816_v0 = vld [vmem:[#allocation40_spill] sm:$0xff] }
  0x71   : > { %v2757_v13 = vmul.f32 %v2521_v34, %v3811_v17  ;;  %v2761_v9 = vmul.f32 %v3814_v21, %v3813_v4  ;;  %v2765_v29 = vmul.f32 %v3817_v16, %v3816_v0  ;;  %v3819_v2 = vld [vmem:[#allocation41_spill] sm:$0xff]  ;;  %v3820_v37 = vld [vmem:[#allocation42_spill] sm:$0xff]  ;;  %v3822_v55 = vld [vmem:[#allocation43_spill] sm:$0xff] }
  0x72   : > { %3810 = vst [vmem:[#allocation73_spill] sm:$0xff] %v2753_v24  ;;  %v2769_v32 = vmul.f32 %v2533_v39, %v3819_v2  ;;  %v3821_v25 = vld [vmem:[#allocation78_spill] sm:$0xff]  ;;  %v3823_v24 = vld [vmem:[#allocation79_spill] sm:$0xff]  ;;  %v3824_v17 = vld [vmem:[#allocation44_spill] sm:$0xff] }
  0x73   : > { %3812 = vst [vmem:[#allocation74_spill] sm:$0xff] %v2757_v13  ;;  %3815 = vst [vmem:[#allocation75_spill] sm:$0xff] %v2761_v9  ;;  %v2773_v6 = vmul.f32 %v3821_v25, %v3820_v37  ;;  %v2777_v34 = vmul.f32 %v3823_v24, %v3822_v55  ;;  %v2781_v21 = vmul.f32 %v2545_v45, %v3824_v17  ;;  %v3825_v4 = vld [vmem:[#allocation45_spill] sm:$0xff]  ;;  %v3826_v9 = vld [vmem:[#allocation80_spill] sm:$0xff] }
  0x74   : > { %3818 = vst [vmem:[#allocation76_spill] sm:$0xff] %v2765_v29  ;;  %v2785_v16 = vmul.f32 %v3826_v9, %v3825_v4  ;;  %v3827_v0 = vld [vmem:[#allocation46_spill] sm:$0xff]  ;;  %v3828_v29 = vld [vmem:[#allocation81_spill] sm:$0xff]  ;;  %v3830_v2 = vld [vmem:[#allocation47_spill] sm:$0xff] }
  0x75   : > { %v2789_v39 = vmul.f32 %v3828_v29, %v3827_v0  ;;  %v2793_v25 = vmul.f32 %v2557_v30, %v3830_v2  ;;  %v3831_v37 = vld [vmem:[#allocation48_spill] sm:$0xff]  ;;  %v3832_v13 = vld [vmem:[#allocation82_spill] sm:$0xff]  ;;  %v3833_v55 = vld [vmem:[#allocation49_spill] sm:$0xff] }
  0x76   : > { %v2797_v24 = vmul.f32 %v3832_v13, %v3831_v37  ;;  %v2801_v45 = vmul.f32 %v2565_v63, %v3833_v55  ;;  %v3834_v17 = vld [vmem:[#allocation50_spill] sm:$0xff]  ;;  %v3835_v4 = vld [vmem:[#allocation51_spill] sm:$0xff]  ;;  %v3836_v0 = vld [vmem:[#allocation52_spill] sm:$0xff] }
  0x77   : > { %3829 = vst [vmem:[#allocation77_spill] sm:$0xff] %v2789_v39  ;;  %v2805_v9 = vmul.f32 %v2569_v20, %v3834_v17  ;;  %v2809_v29 = vmul.f32 %v2573_v35, %v3835_v4  ;;  %v3837_v39 = vld [vmem:[#allocation83_spill] sm:$0xff]  ;;  %v3838_v2 = vld [vmem:[#allocation53_spill] sm:$0xff]  ;;  %v3839_v37 = vld [vmem:[#allocation54_spill] sm:$0xff] }
  0x78   : > { %v2813_v30 = vmul.f32 %v3837_v39, %v3836_v0  ;;  %v2817_v13 = vmul.f32 %v2581_v40, %v3838_v2  ;;  %v2821_v63 = vmul.f32 %v2585_v26, %v3839_v37  ;;  %v3840_v55 = vld [vmem:[#allocation55_spill] sm:$0xff]  ;;  %v3841_v17 = vld [vmem:[#allocation56_spill] sm:$0xff]  ;;  %v3842_v4 = vld [vmem:[#allocation57_spill] sm:$0xff] }
  0x79   : > { %v2825_v20 = vmul.f32 %v2589_v57, %v3840_v55  ;;  %v2829_v35 = vmul.f32 %v2593_v27, %v3841_v17  ;;  %v2833_v39 = vmul.f32 %v2597_v46, %v3842_v4  ;;  %v3843_v0 = vld [vmem:[#allocation58_spill] sm:$0xff]  ;;  %v3844_v2 = vld [vmem:[#allocation59_spill] sm:$0xff]  ;;  %v3845_v37 = vld [vmem:[#allocation60_spill] sm:$0xff] }
  0x7a   : > { %v2837_v40 = vmul.f32 %v2601_v48, %v3843_v0  ;;  %v2841_v26 = vmul.f32 %v2605_v19, %v3844_v2  ;;  %v2845_v57 = vmul.f32 %v2609_v51, %v3845_v37  ;;  %v3846_v55 = vld [vmem:[#allocation61_spill] sm:$0xff]  ;;  %v3847_v17 = vld [vmem:[#allocation62_spill] sm:$0xff]  ;;  %v3848_v4 = vld [vmem:[#allocation63_spill] sm:$0xff]  ;;  %v483_v51 = vsel %vm482_vm0, %v418_v14, 0.0 }
  0x7b   : > { %v2849_v27 = vmul.f32 %v2613_v31, %v3846_v55  ;;  %v2853_v46 = vmul.f32 %v2617_v38, %v3847_v17  ;;  %v2857_v48 = vmul.f32 %v2621_v59, %v3848_v4  ;;  %v3849_v0 = vld [vmem:[#allocation64_spill] sm:$0xff]  ;;  %v484_v2 = vsel %vm482_vm0, %v419_v50, 0.0  ;;  %v3851_v37 = vld [vmem:[#allocation65_spill] sm:$0xff]  ;;  %v3852_v38 = vld [vmem:[#allocation66_spill] sm:$0xff] }
  0x7c   : > { %v2861_v19 = vmul.f32 %v2625_v49, %v3849_v0  ;;  %v486_v31 = vsel %vm482_vm0, %v420_v61, 0.0  ;;  %v2868_v55 = vmul.f32 %v2629_v56, %v3851_v37  ;;  %v2872_v17 = vmul.f32 %v2633_v43, %v3852_v38  ;;  %v3853_v59 = vld [vmem:[#allocation67_spill] sm:$0xff] }
  0x7d   : > { %v2876_v4 = vmul.f32 %v2637_v42, %v3853_v59  ;;  %v485_v49 = vadd.f32 %v484_v2, %v483_v51  ;;  %v488_v0 = vsel %vm482_vm0, %v421_v7, 0.0  ;;  %v504_v14 = vsel %vm482_vm0, %v426_v58, 0.0 }
  0x7e   : > { %3850 = vst [vmem:[#allocation78_spill] sm:$0xff] %v2861_v19  ;;  %v505_v50 = vsel %vm482_vm0, %v427_v53, 0.0  ;;  %v507_v61 = vsel %vm482_vm0, %v428_v5, 0.0  ;;  %v490_v56 = vsel %vm482_vm0, %v2669_v23, 0.0  ;;  %v492_v43 = vsel %vm482_vm0, %v2673_v28, 0.0 }
  0x7f   : > { %v487_v19 = vadd.f32 %v486_v31, %v485_v49  ;;  %v506_v37 = vadd.f32 %v505_v50, %v504_v14  ;;  %v494_v42 = vsel %vm482_vm0, %v2677_v33, 0.0  ;;  %v496_v7 = vsel %vm482_vm0, %v2681_v36, 0.0 }
  0x80   : > { %v509_v58 = vsel %vm482_vm0, %v2691_v47, 0.0  ;;  %v525_v53 = vsel %vm482_vm0, %v434_v52, 0.0  ;;  %v526_v2 = vsel %vm482_vm0, %v435_v41, 0.0  ;;  %v528_v23 = vsel %vm482_vm0, %v436_v1, 0.0 }
  0x81   : > { %v489_v5 = vadd.f32 %v488_v0, %v487_v19  ;;  %v508_v51 = vadd.f32 %v507_v61, %v506_v37  ;;  %v511_v28 = vsel %vm482_vm0, %v2695_v11, 0.0  ;;  %v513_v33 = vsel %vm482_vm0, %v2699_v54, 0.0 }
  0x82   : > { %v515_v36 = vsel %vm482_vm0, %v2703_v44, 0.0  ;;  %v527_v31 = vadd.f32 %v526_v2, %v525_v53  ;;  %v517_v52 = vsel %vm482_vm0, %v2707_v62, 0.0  ;;  %v530_v41 = vsel %vm482_vm0, %v2717_v10, 0.0  ;;  %v3856_v2 = vld [vmem:[#allocation74_spill] sm:$0xff] }
  0x83   : > { %v491_v38 = vadd.f32 %v490_v56, %v489_v5  ;;  %v510_v47 = vadd.f32 %v509_v58, %v508_v51  ;;  %v546_v1 = vsel %vm482_vm0, %v2737_v18, 0.0  ;;  %v547_v11 = vsel %vm482_vm0, %v2741_v22, 0.0  ;;  %v3855_v5 = vld [vmem:[#allocation89_spill] sm:$0xff] }
  0x84   : > { %v529_v19 = vadd.f32 %v528_v23, %v527_v31  ;;  %v549_v54 = vsel %vm482_vm0, %v2745_v60, 0.0  ;;  %v532_v49 = vsel %vm482_vm0, %v2721_v12, 0.0  ;;  %v548_v0 = vadd.f32 %v547_v11, %v546_v1  ;;  %v3854_v60 = vld [vmem:[#allocation73_spill] sm:$0xff] }
  0x85   : > { %v493_v44 = vadd.f32 %v492_v43, %v491_v38  ;;  %v512_v59 = vadd.f32 %v511_v28, %v510_v47  ;;  %v534_v10 = vsel %vm482_vm0, %v2725_v15, 0.0  ;;  %v536_v14 = vsel %vm482_vm0, %v2729_v3, 0.0 }
  0x86   : > { %v531_v62 = vadd.f32 %v530_v41, %v529_v19  ;;  %v551_v18 = vsel %vm482_vm0, %v2749_v8, 0.0  ;;  %v550_v61 = vadd.f32 %v549_v54, %v548_v0  ;;  %v553_v56 = vsel %vm482_vm0, %v3854_v60, 0.0 }
  0x87   : > { %v495_v22 = vadd.f32 %v494_v42, %v493_v44  ;;  %v514_v50 = vadd.f32 %v513_v33, %v512_v59  ;;  %v567_v12 = vsel %vm482_vm0, %v2769_v32, 0.0  ;;  %v568_v37 = vsel %vm482_vm0, %v2773_v6, 0.0  ;;  %v3859_v44 = vld [vmem:[#allocation77_spill] sm:$0xff] }
  0x88   : > { %v533_v43 = vadd.f32 %v532_v49, %v531_v62  ;;  %v570_v15 = vsel %vm482_vm0, %v2777_v34, 0.0  ;;  %v552_v53 = vadd.f32 %v551_v18, %v550_v61  ;;  %v569_v8 = vadd.f32 %v568_v37, %v567_v12  ;;  %v3857_v34 = vld [vmem:[#allocation75_spill] sm:$0xff] }
  0x89   : > { %v497_v3 = vadd.f32 %v496_v7, %v495_v22  ;;  %v516_v58 = vadd.f32 %v515_v36, %v514_v50  ;;  %v538_v51 = vsel %vm482_vm0, %v3855_v5, 0.0  ;;  %v555_v23 = vsel %vm482_vm0, %v3856_v2, 0.0 }
  0x8a   : > { %v535_v42 = vadd.f32 %v534_v10, %v533_v43  ;;  %v572_v32 = vsel %vm482_vm0, %v2781_v21, 0.0  ;;  %v554_v6 = vadd.f32 %v553_v56, %v552_v53  ;;  %v571_v31 = vadd.f32 %v570_v15, %v569_v8  ;;  %v3858_v21 = vld [vmem:[#allocation76_spill] sm:$0xff] }
  0x8b   : > { %v498_v28 = vrot.slane %v497_v3, 4  ;;  %v518_v33 = vadd.f32 %v517_v52, %v516_v58  ;;  %v557_v7 = vsel %vm482_vm0, %v3857_v34, 0.0  ;;  %v574_v36 = vsel %vm482_vm0, %v2785_v16, 0.0  ;;  %v3860_v10 = vld [vmem:[#allocation68_spill] sm:$0xff]  ;;  %v3863_v58 = vld [vmem:[#allocation85_spill] sm:$0xff] }
  0x8c   : > { %v537_v38 = vadd.f32 %v536_v14, %v535_v42  ;;  %v588_v47 = vsel %vm482_vm0, %v2801_v45, 0.0  ;;  %v556_v1 = vadd.f32 %v555_v23, %v554_v6  ;;  %v573_v11 = vadd.f32 %v572_v32, %v571_v31  ;;  %v3861_v14 = vld [vmem:[#allocation84_spill] sm:$0xff] }
  0x8d   : > { %v499_v41 = vadd.f32 %v498_v28, %v497_v3  ;;  %v519_v19 = vrot.slane %v518_v33, 4  ;;  %v559_v52 = vsel %vm482_vm0, %v3858_v21, 0.0  ;;  %v576_v59 = vsel %vm482_vm0, %v3859_v44, 0.0  ;;  %v3862_v3 = vld [vmem:[#allocation69_spill] sm:$0xff] }
  0x8e   : > { %v539_v54 = vadd.f32 %v538_v51, %v537_v38  ;;  %v589_v49 = vsel %vm482_vm0, %v2805_v9, 0.0  ;;  %v558_v62 = vadd.f32 %v557_v7, %v556_v1  ;;  %v575_v16 = vadd.f32 %v574_v36, %v573_v11  ;;  %v3864_v7 = vld [vmem:[#allocation70_spill] sm:$0xff] }
  0x8f   : > { %v520_v0 = vadd.f32 %v519_v19, %v518_v33  ;;  %v591_v45 = vsel %vm482_vm0, %v2809_v29, 0.0  ;;  %v477_v18 = vmul.f32 %v3861_v14, %v3860_v10  ;;  %v578_v50 = vsel %vm482_vm0, %v2793_v25, 0.0 }
  0x90   : > { %v540_v22 = vrot.slane %v539_v54, 4  ;;  %v590_v61 = vadd.f32 %v589_v49, %v588_v47  ;;  %v500_v60 = vrot.slane %v499_v41, 2  ;;  %v560_v56 = vadd.f32 %v559_v52, %v558_v62 }
  0x91   : > { %v577_v43 = vadd.f32 %v576_v59, %v575_v16  ;;  %v593_v9 = vsel %vm482_vm0, %v2813_v30, 0.0  ;;  %v521_v12 = vrot.slane %v520_v0, 2  ;;  %v580_v15 = vsel %vm482_vm0, %v2797_v24, 0.0 }
  0x92   : > { %v541_v37 = vadd.f32 %v540_v22, %v539_v54  ;;  %v592_v29 = vadd.f32 %v591_v45, %v590_v61  ;;  %v478_v53 = vmul.f32 %v3863_v58, %v3862_v3  ;;  %v561_v8 = vrot.slane %v560_v56, 4  ;;  %v3870_v58 = vld [vmem:[#allocation88_spill] sm:$0xff] }
  0x93   : > { %v579_v42 = vadd.f32 %v578_v50, %v577_v43  ;;  %v595_v25 = vsel %vm482_vm0, %v2817_v13, 0.0  ;;  %v597_v51 = vsel %vm482_vm0, %v2821_v63, 0.0  ;;  %v609_v30 = vsel %vm482_vm0, %v2833_v39, 0.0 }
  0x94   : > { %v594_v5 = vadd.f32 %v593_v9, %v592_v29  ;;  %v610_v2 = vsel %vm482_vm0, %v2837_v40, 0.0  ;;  %v501_v24 = vadd.f32 %v500_v60, %v499_v41  ;;  %v542_v23 = vrot.slane %v541_v37, 2  ;;  %v3865_v40 = vld [vmem:[#allocation86_spill] sm:$0xff]  ;;  %v3866_v60 = vld [vmem:[#allocation71_spill] sm:$0xff] }
  0x95   : > { %v562_v32 = vadd.f32 %v561_v8, %v560_v56  ;;  %v581_v28 = vadd.f32 %v580_v15, %v579_v42  ;;  %v522_v33 = vadd.f32 %v521_v12, %v520_v0  ;;  %v611_v31 = vadd.f32 %v610_v2, %v609_v30  ;;  %v3867_v56 = vld [vmem:[#allocation87_spill] sm:$0xff]  ;;  %v3868_v9 = vld [vmem:[#allocation78_spill] sm:$0xff] }
  0x96   : > { %v596_v6 = vadd.f32 %v595_v25, %v594_v5  ;;  %v612_v13 = vsel %vm482_vm0, %v2841_v26, 0.0  ;;  %v599_v63 = vsel %vm482_vm0, %v2825_v20, 0.0  ;;  %v614_v39 = vsel %vm482_vm0, %v2845_v57, 0.0 }
  0x97   : > { %v563_v38 = vrot.slane %v562_v32, 2  ;;  %v582_v34 = vrot.slane %v581_v28, 4  ;;  %v479_v36 = vmul.f32 %v3865_v40, %v3864_v7  ;;  %v601_v41 = vsel %vm482_vm0, %v2829_v35, 0.0 }
  0x98   : > { %v598_v47 = vadd.f32 %v597_v51, %v596_v6  ;;  %v613_v19 = vadd.f32 %v612_v13, %v611_v31  ;;  %v502_v1 = vrot.slane %v501_v24, 1  ;;  %v543_v11 = vadd.f32 %v542_v23, %v541_v37 }
  0x99   : > { %v583_v54 = vadd.f32 %v582_v34, %v581_v28  ;;  %v616_v26 = vsel %vm482_vm0, %v2849_v27, 0.0  ;;  %v523_v21 = vrot.slane %v522_v33, 1  ;;  %v564_v52 = vadd.f32 %v563_v38, %v562_v32 }
  0x9a   : > { %v600_v20 = vadd.f32 %v599_v63, %v598_v47  ;;  %v615_v44 = vadd.f32 %v614_v39, %v613_v19  ;;  %v618_v57 = vsel %vm482_vm0, %v2853_v46, 0.0  ;;  %v630_v49 = vsel %vm482_vm0, %v2868_v55, 0.0 }
  0x9b   : > { %v584_v59 = vrot.slane %v583_v54, 2  ;;  %v631_v35 = vsel %vm482_vm0, %v2872_v17, 0.0  ;;  %v633_v27 = vsel %vm482_vm0, %v2876_v4, 0.0  ;;  %v503_v45 = vadd.f32 %v502_v1, %v501_v24 }
  0x9c   : > { %v602_v0 = vadd.f32 %v601_v41, %v600_v20  ;;  %v617_v62 = vadd.f32 %v616_v26, %v615_v44  ;;  %v632_v16 = vadd.f32 %v631_v35, %v630_v49  ;;  %v544_v10 = vrot.slane %v543_v11, 1 }
  0x9d   : > { %v620_v14 = vsel %vm482_vm0, %v2857_v48, 0.0  ;;  %v635_v22 = vsel %vm482_vm0, %v477_v18, 0.0  ;;  %v524_v46 = vadd.f32 %v523_v21, %v522_v33  ;;  %v480_v17 = vmul.f32 %v3867_v56, %v3866_v60  ;;  %v3869_v48 = vld [vmem:[#allocation72_spill] sm:$0xff] }
  0x9e   : > { %v603_v50 = vrot.slane %v602_v0, 4  ;;  %v619_v61 = vadd.f32 %v618_v57, %v617_v62  ;;  %v634_v55 = vadd.f32 %v633_v27, %v632_v16  ;;  %v585_v43 = vadd.f32 %v584_v59, %v583_v54 }
  0x9f   : > { %v622_v12 = vsel %vm482_vm0, %v3868_v9, 0.0  ;;  %v637_v4 = vsel %vm482_vm0, %v478_v53, 0.0  ;;  %v565_v37 = vrot.slane %v564_v52, 1  ;;  %v481_v18 = vmul.f32 %v3870_v58, %v3869_v48 }
  0xa0   : > { %v604_v15 = vadd.f32 %v603_v50, %v602_v0  ;;  %v621_v29 = vadd.f32 %v620_v14, %v619_v61  ;;  %v636_v3 = vadd.f32 %v635_v22, %v634_v55  ;;  %v545_v8 = vadd.f32 %v544_v10, %v543_v11 }
  0xa1   : > { %v639_v42 = vsel %vm482_vm0, %v479_v36, 0.0  ;;  %v652_v25 = vmul.f32 0.015625, %v503_v45  ;;  %v653_v2 = vmul.f32 0.015625, %v524_v46  ;;  %v586_v24 = vrot.slane %v585_v43, 1 }
  0xa2   : > { %v605_v5 = vrot.slane %v604_v15, 2  ;;  %v623_v51 = vadd.f32 %v622_v12, %v621_v29  ;;  %v638_v30 = vadd.f32 %v637_v4, %v636_v3  ;;  %v641_v23 = vsel %vm482_vm0, %v480_v17, 0.0 }
  0xa3   : > { %v566_v53 = vadd.f32 %v565_v37, %v564_v52  ;;  %v643_v6 = vsel %vm482_vm0, %v481_v18, 0.0  ;;  %v654_v31 = vmul.f32 0.015625, %v545_v8  ;;  %v669_v63 = vsel %vm668_vm1, %v653_v2, %v652_v25 }
  0xa4   : > { %v606_v32 = vadd.f32 %v605_v5, %v604_v15  ;;  %v624_v28 = vrot.slane %v623_v51, 4  ;;  %v640_v33 = vadd.f32 %v639_v42, %v638_v30  ;;  %v587_v39 = vadd.f32 %v586_v24, %v585_v43 }
  0xa5   : > { %v655_v36 = vmul.f32 0.015625, %v566_v53  ;;  %v671_v47 = vsel %vm670_vm2, %v654_v31, %v669_v63 }
  0xa6   : > { %v607_v13 = vrot.slane %v606_v32, 1  ;;  %v625_v38 = vadd.f32 %v624_v28, %v623_v51  ;;  %v642_v34 = vadd.f32 %v641_v23, %v640_v33  ;;  %v656_v11 = vmul.f32 0.015625, %v587_v39 }
  0xa7   : > { %v673_v21 = vsel %vm672_vm3, %v655_v36, %v671_v47 }
  0xa8   : > { %v626_v7 = vrot.slane %v625_v38, 2  ;;  %v644_v40 = vadd.f32 %v643_v6, %v642_v34  ;;  %v608_v41 = vadd.f32 %v607_v13, %v606_v32  ;;  %v675_v59 = vsel %vm674_vm4, %v656_v11, %v673_v21 }
  0xaa   : > { %v627_v19 = vadd.f32 %v626_v7, %v625_v38  ;;  %v645_v1 = vrot.slane %v644_v40, 4  ;;  %v657_v44 = vmul.f32 0.015625, %v608_v41 }
  0xac   : > { %v628_v54 = vrot.slane %v627_v19, 1  ;;  %v646_v26 = vadd.f32 %v645_v1, %v644_v40  ;;  %v677_v0 = vsel %vm676_vm5, %v657_v44, %v675_v59 }
  0xae   : > { %v629_v52 = vadd.f32 %v628_v54, %v627_v19  ;;  %v647_v20 = vrot.slane %v646_v26, 2 }
  0xb0   : > { %v648_v57 = vadd.f32 %v647_v20, %v646_v26  ;;  %v658_v49 = vmul.f32 0.015625, %v629_v52 }
  0xb2   : > { %v649_v35 = vrot.slane %v648_v57, 1  ;;  %v679_v16 = vsel %vm678_vm6, %v658_v49, %v677_v0 }
  0xb4   : > { %v650_v62 = vadd.f32 %v649_v35, %v648_v57 }
  0xb6   : > { %v659_v27 = vmul.f32 0.015625, %v650_v62 }
  0xb8   : > { %v681_v45 = vsel %vm680_vm7, %v659_v27, %v679_v16 }
  0xb9   : > { %683 = vst.msk [vmem:[#allocation2] sm:$0xff] %vm482_vm0, %v681_v45 }
  0xba PF: > { %686 = sbr.rel (%p350_p2) target bundleno = 358 (0x166), region = 36 }
  0xbf   : > { %v3871_v10 = vld [vmem:[#allocation9_spill] sm:$0xff]  ;;  %v3872_v14 = vld [vmem:[#allocation10_spill] sm:$0xff]  ;;  %v3873_v22 = vld [vmem:[#allocation11_spill] sm:$0xff]  ;;  %v3033_v19 = vstv %s2019_s4  ;;  %vm1008_vm8 = vcmask 261120   ;;  %vm1194_vm9 = vcmask 1041409   ;;  %vm1196_vm10 = vcmask 1042434  }
  0xc0   : > { %1602 = vlog2.f32 %v3871_v10  ;;  %v3874_v46 = vld [vmem:[#allocation12_spill] sm:$0xff]  ;;  %v3875_v50 = vld [vmem:[#allocation13_spill] sm:$0xff]  ;;  %v3876_v61 = vld [vmem:[#allocation14_spill] sm:$0xff]  ;;  %vm1198_vm11 = vcmask 1043459   ;;  %vm1200_vm12 = vcmask 1044484   ;;  %vm1202_vm13 = vcmask 1045509  }
  0xc1   : > { %1604 = vlog2.f32 %v3872_v14  ;;  %v3877_v55 = vld [vmem:[#allocation15_spill] sm:$0xff]  ;;  %v3878_v60 = vld [vmem:[#allocation16_spill] sm:$0xff]  ;;  %v3879_v56 = vld [vmem:[#allocation17_spill] sm:$0xff]  ;;  %vm1204_vm14 = vcmask 1046534   ;;  %vm1206_vm15 = vcmask 1047559  }
  0xc2   : > { %1606 = vlog2.f32 %v3873_v22  ;;  %v3880_v17 = vld [vmem:[#allocation18_spill] sm:$0xff]  ;;  %v3881_v43 = vld [vmem:[#allocation19_spill] sm:$0xff]  ;;  %v3882_v9 = vld [vmem:[#allocation20_spill] sm:$0xff] }
  0xc3   : > { %1608 = vlog2.f32 %v3874_v46  ;;  %v3883_v12 = vld [vmem:[#allocation21_spill] sm:$0xff]  ;;  %v3884_v37 = vld [vmem:[#allocation22_spill] sm:$0xff]  ;;  %v3885_v29 = vld [vmem:[#allocation23_spill] sm:$0xff] }
  0xc4   : > { %1610 = vlog2.f32 %v3875_v50  ;;  %v3886_v48 = vld [vmem:[#allocation24_spill] sm:$0xff]  ;;  %v3887_v18 = vld [vmem:[#allocation25_spill] sm:$0xff]  ;;  %v3888_v42 = vld [vmem:[#allocation26_spill] sm:$0xff] }
  0xc5   : > { %1612 = vlog2.f32 %v3876_v61  ;;  %v3889_v5 = vld [vmem:[#allocation27_spill] sm:$0xff]  ;;  %v3890_v30 = vld [vmem:[#allocation28_spill] sm:$0xff]  ;;  %v3891_v24 = vld [vmem:[#allocation29_spill] sm:$0xff] }
  0xc6   : > { %1614 = vlog2.f32 %v3877_v55  ;;  %v3892_v53 = vld [vmem:[#allocation30_spill] sm:$0xff]  ;;  %v3893_v28 = vld [vmem:[#allocation31_spill] sm:$0xff]  ;;  %v3894_v6 = vld [vmem:[#allocation32_spill] sm:$0xff] }
  0xc7   : > { %1616 = vlog2.f32 %v3878_v60  ;;  %v3895_v13 = vld [vmem:[#allocation33_spill] sm:$0xff]  ;;  %v3896_v34 = vld [vmem:[#allocation34_spill] sm:$0xff]  ;;  %v3897_v39 = vld [vmem:[#allocation35_spill] sm:$0xff] }
  0xc8   : > { %1618 = vlog2.f32 %v3879_v56  ;;  %v3898_v36 = vld [vmem:[#allocation36_spill] sm:$0xff]  ;;  %v3899_v41 = vld [vmem:[#allocation37_spill] sm:$0xff]  ;;  %v3900_v54 = vld [vmem:[#allocation38_spill] sm:$0xff] }
  0xc9   : > { %1620 = vlog2.f32 %v3880_v17  ;;  %v3901_v20 = vld [vmem:[#allocation39_spill] sm:$0xff]  ;;  %v3902_v57 = vld [vmem:[#allocation40_spill] sm:$0xff]  ;;  %v3903_v16 = vld [vmem:[#allocation41_spill] sm:$0xff] }
  0xca   : > { %1622 = vlog2.f32 %v3881_v43  ;;  %v3904_v10 = vld [vmem:[#allocation42_spill] sm:$0xff]  ;;  %v3905_v50 = vld [vmem:[#allocation43_spill] sm:$0xff]  ;;  %v3906_v56 = vld [vmem:[#allocation44_spill] sm:$0xff] }
  0xcb   : > { %1624 = vlog2.f32 %v3882_v9 }
  0xcc   : > { %1626 = vlog2.f32 %v3883_v12 }
  0xcd   : > { %v1603_v4 = vpop.eup %1602  ;;  %1628 = vlog2.f32 %v3884_v37 }
  0xce   : > { %v1605_v15 = vpop.eup %1604  ;;  %1630 = vlog2.f32 %v3885_v29  ;;  %v688_v40 = vmul.f32 0.6931472, %v1603_v4  ;;  %v3907_v4 = vld [vmem:[#allocation45_spill] sm:$0xff] }
  0xcf   : > { %v1607_v3 = vpop.eup %1606  ;;  %1632 = vlog2.f32 %v3886_v48  ;;  %v690_v11 = vmul.f32 0.6931472, %v1605_v15  ;;  %v3908_v48 = vld [vmem:[#allocation46_spill] sm:$0xff] }
  0xd0   : > { %v1609_v58 = vpop.eup %1608  ;;  %1634 = vlog2.f32 %v3887_v18  ;;  %v692_v21 = vmul.f32 0.6931472, %v1607_v3  ;;  %v816_v49 = vmul.f32 %v3033_v19, %v688_v40  ;;  %v3912_v40 = vld [vmem:[#allocation50_spill] sm:$0xff] }
  0xd1   : > { %v1611_v8 = vpop.eup %1610  ;;  %1636 = vlog2.f32 %v3888_v42  ;;  %v694_v52 = vmul.f32 0.6931472, %v1609_v58  ;;  %v817_v14 = vmul.f32 %v3033_v19, %v690_v11  ;;  %v3909_v42 = vld [vmem:[#allocation47_spill] sm:$0xff] }
  0xd2   : > { %v1613_v25 = vpop.eup %1612  ;;  %1638 = vlog2.f32 %v3889_v5  ;;  %v696_v59 = vmul.f32 0.6931472, %v1611_v8  ;;  %v818_v61 = vmul.f32 %v3033_v19, %v692_v21  ;;  %v3057_v43 = vmul.f32 1.442695, %v816_v49 }
  0xd3   : > { %v1615_v51 = vpop.eup %1614  ;;  %1640 = vlog2.f32 %v3890_v30  ;;  %v698_v0 = vmul.f32 0.6931472, %v1613_v25  ;;  %v819_v55 = vmul.f32 %v3033_v19, %v694_v52  ;;  %v3068_v18 = vmul.f32 1.442695, %v817_v14 }
  0xd4   : > { %v1617_v2 = vpop.eup %1616  ;;  %1642 = vlog2.f32 %v3891_v24  ;;  %v700_v62 = vmul.f32 0.6931472, %v1615_v51  ;;  %v820_v17 = vmul.f32 %v3033_v19, %v696_v59  ;;  %v3074_v5 = vmul.f32 1.442695, %v818_v61  ;;  %v3917_v61 = vld [vmem:[#allocation55_spill] sm:$0xff] }
  0xd5   : > { %v1619_v23 = vpop.eup %1618  ;;  %1644 = vlog2.f32 %v3892_v53  ;;  %v702_v45 = vmul.f32 0.6931472, %v1617_v2  ;;  %v821_v37 = vmul.f32 %v3033_v19, %v698_v0  ;;  %v3076_v51 = vmul.f32 1.442695, %v819_v55 }
  0xd6   : > { %v1621_v32 = vpop.eup %1620  ;;  %1646 = vlog2.f32 %v3893_v28  ;;  %v704_v46 = vmul.f32 0.6931472, %v1619_v23  ;;  %v822_v15 = vmul.f32 %v3033_v19, %v700_v62  ;;  %v3910_v23 = vld [vmem:[#allocation48_spill] sm:$0xff]  ;;  %v3081_v53 = vmul.f32 1.442695, %v820_v17  ;;  %v3911_v28 = vld [vmem:[#allocation49_spill] sm:$0xff] }
  0xd7   : > { %v1623_v33 = vpop.eup %1622  ;;  %1648 = vlog2.f32 %v3894_v6  ;;  %v706_v12 = vmul.f32 0.6931472, %v1621_v32  ;;  %v823_v58 = vmul.f32 %v3033_v19, %v702_v45  ;;  %v3087_v6 = vmul.f32 1.442695, %v821_v37  ;;  %v3919_v37 = vld [vmem:[#allocation57_spill] sm:$0xff] }
  0xd8   : > { %v1625_v31 = vpop.eup %1624  ;;  %1650 = vlog2.f32 %v3895_v13  ;;  %v708_v3 = vmul.f32 0.6931472, %v1623_v33  ;;  %v824_v25 = vmul.f32 %v3033_v19, %v704_v46  ;;  %v3089_v13 = vmul.f32 1.442695, %v822_v15 }
  0xd9   : > { %v1627_v38 = vpop.eup %1626  ;;  %1652 = vlog2.f32 %v3896_v34  ;;  %v710_v2 = vmul.f32 0.6931472, %v1625_v31  ;;  %v825_v33 = vmul.f32 %v3033_v19, %v706_v12 }
  0xda   : > { %v1629_v63 = vpop.eup %1628  ;;  %1654 = vlog2.f32 %v3897_v39  ;;  %v712_v24 = vmul.f32 0.6931472, %v1627_v38  ;;  %v826_v31 = vmul.f32 %v3033_v19, %v708_v3  ;;  %v3095_v38 = vmul.f32 1.442695, %v823_v58 }
  0xdb   : > { %v3028_v7 = vpop.eup %1630  ;;  %1656 = vlog2.f32 %v3898_v36  ;;  %v714_v39 = vmul.f32 0.6931472, %v1629_v63  ;;  %v3101_v21 = vmul.f32 1.442695, %v824_v25  ;;  %v3914_v63 = vld [vmem:[#allocation52_spill] sm:$0xff]  ;;  %v827_v59 = vmul.f32 %v3033_v19, %v710_v2 }
  0xdc   : > { %v1633_v47 = vpop.eup %1632  ;;  %1658 = vlog2.f32 %v3899_v41  ;;  %v716_v41 = vmul.f32 0.6931472, %v3028_v7  ;;  %v3113_v62 = vmul.f32 1.442695, %v825_v33  ;;  %v3119_v14 = vmul.f32 1.442695, %v826_v31 }
  0xdd   : > { %v3035_v1 = vpop.eup %1634  ;;  %1660 = vlog2.f32 %v3900_v54  ;;  %v718_v11 = vmul.f32 0.6931472, %v1633_v47  ;;  %v3913_v54 = vld [vmem:[#allocation51_spill] sm:$0xff]  ;;  %v3915_v47 = vld [vmem:[#allocation53_spill] sm:$0xff]  ;;  %v3131_v17 = vmul.f32 1.442695, %v827_v59 }
  0xde   : > { %v3038_v26 = vpop.eup %1636  ;;  %1662 = vlog2.f32 %v3901_v20  ;;  %v720_v20 = vmul.f32 0.6931472, %v3035_v1  ;;  %v829_v1 = vmul.f32 %v3033_v19, %v714_v39  ;;  %v3922_v31 = vld [vmem:[#allocation60_spill] sm:$0xff] }
  0xdf   : > { %v1639_v44 = vpop.eup %1638  ;;  %1664 = vlog2.f32 %v3902_v57  ;;  %v828_v57 = vmul.f32 %v3033_v19, %v712_v24  ;;  %v722_v0 = vmul.f32 0.6931472, %v3038_v26  ;;  %v830_v26 = vmul.f32 %v3033_v19, %v716_v41 }
  0xe0   : > { %v1641_v35 = vpop.eup %1640  ;;  %1666 = vlog2.f32 %v3903_v16  ;;  %v724_v7 = vmul.f32 0.6931472, %v1639_v44  ;;  %v831_v44 = vmul.f32 %v3033_v19, %v718_v11  ;;  %v3146_v2 = vmul.f32 1.442695, %v829_v1  ;;  %v3925_v1 = vld [vmem:[#allocation63_spill] sm:$0xff] }
  0xe1   : > { %v3044_v27 = vpop.eup %1642  ;;  %1668 = vlog2.f32 %v3904_v10  ;;  %v726_v45 = vmul.f32 0.6931472, %v1641_v35  ;;  %v3916_v10 = vld [vmem:[#allocation54_spill] sm:$0xff]  ;;  %v832_v35 = vmul.f32 %v3033_v19, %v720_v20  ;;  %v3133_v12 = vmul.f32 1.442695, %v828_v57 }
  0xe2   : > { %v3048_v22 = vpop.eup %1644  ;;  %1670 = vlog2.f32 %v3905_v50  ;;  %v728_v50 = vmul.f32 0.6931472, %v3044_v27  ;;  %v833_v15 = vmul.f32 %v3033_v19, %v722_v0  ;;  %v834_v3 = vmul.f32 %v3033_v19, %v724_v7  ;;  %v3924_v0 = vld [vmem:[#allocation62_spill] sm:$0xff] }
  0xe3   : > { %v3053_v60 = vpop.eup %1646  ;;  %1672 = vlog2.f32 %v3906_v56  ;;  %v3918_v56 = vld [vmem:[#allocation56_spill] sm:$0xff]  ;;  %v730_v27 = vmul.f32 0.6931472, %v3048_v22  ;;  %v835_v25 = vmul.f32 %v3033_v19, %v726_v45  ;;  %v3154_v33 = vmul.f32 1.442695, %v831_v44 }
  0xe4   : > { %v3059_v9 = vpop.eup %1648  ;;  %1674 = vlog2.f32 %v3907_v4  ;;  %v732_v58 = vmul.f32 0.6931472, %v3053_v60  ;;  %v836_v22 = vmul.f32 %v3033_v19, %v728_v50  ;;  %v3161_v41 = vmul.f32 1.442695, %v832_v35 }
  0xe5   : > { %v3064_v29 = vpop.eup %1650  ;;  %1676 = vlog2.f32 %v3908_v48  ;;  %v734_v60 = vmul.f32 0.6931472, %v3059_v9  ;;  %v837_v20 = vmul.f32 %v3033_v19, %v730_v27  ;;  %v3169_v59 = vmul.f32 1.442695, %v834_v3  ;;  %v3927_v27 = vld [vmem:[#allocation65_spill] sm:$0xff]  ;;  %v3928_v3 = vld [vmem:[#allocation66_spill] sm:$0xff] }
  0xe6   : > { %v3070_v8 = vpop.eup %1652  ;;  %1678 = vlog2.f32 %v3909_v42  ;;  %v3920_v42 = vld [vmem:[#allocation58_spill] sm:$0xff]  ;;  %v3176_v7 = vmul.f32 1.442695, %v835_v25  ;;  %v3183_v50 = vmul.f32 1.442695, %v836_v22 }
  0xe7   : > { %v3078_v30 = vpop.eup %1654  ;;  %1680 = vlog2.f32 %v3910_v23  ;;  %v3921_v23 = vld [vmem:[#allocation59_spill] sm:$0xff]  ;;  %v738_v9 = vmul.f32 0.6931472, %v3070_v8  ;;  %v839_v44 = vmul.f32 %v3033_v19, %v734_v60 }
  0xe8   : > { %v3083_v32 = vpop.eup %1656  ;;  %1682 = vlog2.f32 %v3911_v28  ;;  %v3152_v28 = vmul.f32 1.442695, %v830_v26  ;;  %v740_v45 = vmul.f32 0.6931472, %v3078_v30  ;;  %v3926_v26 = vld [vmem:[#allocation64_spill] sm:$0xff] }
  0xe9   : > { %v3091_v34 = vpop.eup %1658  ;;  %1684 = vlog2.f32 %v3912_v40  ;;  %v736_v40 = vmul.f32 0.6931472, %v3064_v29  ;;  %v838_v29 = vmul.f32 %v3033_v19, %v732_v58  ;;  %v841_v58 = vmul.f32 %v3033_v19, %v738_v9  ;;  %v3931_v9 = vld [vmem:[#allocation69_spill] sm:$0xff] }
  0xea   : > { %v3097_v36 = vpop.eup %1660  ;;  %1686 = vlog2.f32 %v3913_v54  ;;  %v3923_v54 = vld [vmem:[#allocation61_spill] sm:$0xff]  ;;  %v744_v8 = vmul.f32 0.6931472, %v3091_v34 }
  0xeb   : > { %v3103_v52 = vpop.eup %1662  ;;  %1688 = vlog2.f32 %v3914_v63  ;;  %v3167_v63 = vmul.f32 1.442695, %v833_v15  ;;  %v746_v30 = vmul.f32 0.6931472, %v3097_v36 }
  0xec   : > { %v3109_v49 = vpop.eup %1664  ;;  %1690 = vlog2.f32 %v3915_v47 }
  0xed   : > { %v3115_v16 = vpop.eup %1666  ;;  %1692 = vlog2.f32 %v3916_v10  ;;  %v742_v10 = vmul.f32 0.6931472, %v3083_v32  ;;  %v748_v32 = vmul.f32 0.6931472, %v3103_v52  ;;  %v750_v34 = vmul.f32 0.6931472, %v3109_v49 }
  0xee   : > { %v3121_v46 = vpop.eup %1668  ;;  %1694 = vlog2.f32 %v3917_v61  ;;  %v752_v36 = vmul.f32 0.6931472, %v3115_v16  ;;  %v842_v52 = vmul.f32 %v3033_v19, %v740_v45  ;;  %v844_v49 = vmul.f32 %v3033_v19, %v744_v8 }
  0xef   : > { %v3127_v55 = vpop.eup %1670  ;;  %1696 = vlog2.f32 %v3918_v56  ;;  %v840_v56 = vmul.f32 %v3033_v19, %v736_v40  ;;  %v843_v22 = vmul.f32 %v3033_v19, %v742_v10  ;;  %v3930_v40 = vld [vmem:[#allocation68_spill] sm:$0xff]  ;;  %v754_v16 = vmul.f32 0.6931472, %v3121_v46 }
  0xf0   : > { %v3135_v4 = vpop.eup %1672  ;;  %1698 = vlog2.f32 %v3919_v37  ;;  %v3196_v37 = vmul.f32 1.442695, %v837_v20  ;;  %v756_v10 = vmul.f32 0.6931472, %v3127_v55  ;;  %v847_v8 = vmul.f32 %v3033_v19, %v750_v34 }
  0xf1   : > { %v3141_v48 = vpop.eup %1674  ;;  %1700 = vlog2.f32 %v3920_v42  ;;  %v3203_v42 = vmul.f32 1.442695, %v838_v29  ;;  %v846_v29 = vmul.f32 %v3033_v19, %v748_v32  ;;  %v848_v46 = vmul.f32 %v3033_v19, %v752_v36 }
  0xf2   : > { %v3148_v24 = vpop.eup %1676  ;;  %1702 = vlog2.f32 %v3921_v23  ;;  %v3929_v23 = vld [vmem:[#allocation67_spill] sm:$0xff]  ;;  %v758_v55 = vmul.f32 0.6931472, %v3135_v4  ;;  %v3245_v34 = vmul.f32 1.442695, %v844_v49 }
  0xf3   : > { %v3156_v39 = vpop.eup %1678  ;;  %1704 = vlog2.f32 %v3922_v31  ;;  %v3215_v31 = vmul.f32 1.442695, %v839_v44  ;;  %v762_v4 = vmul.f32 0.6931472, %v3148_v24  ;;  %v3260_v49 = vmul.f32 1.442695, %v847_v8 }
  0xf4   : > { %v3163_v11 = vpop.eup %1680  ;;  %1706 = vlog2.f32 %v3923_v54  ;;  %v3217_v54 = vmul.f32 1.442695, %v840_v56  ;;  %v3933_v56 = vld [vmem:[#allocation71_spill] sm:$0xff] }
  0xf5   : > { %v3171_v57 = vpop.eup %1682  ;;  %1708 = vlog2.f32 %v3924_v0  ;;  %v845_v0 = vmul.f32 %v3033_v19, %v746_v30  ;;  %v3238_v30 = vmul.f32 1.442695, %v843_v22 }
  0xf6   : > { %v3178_v47 = vpop.eup %1684  ;;  %1710 = vlog2.f32 %v3925_v1  ;;  %v3932_v1 = vld [vmem:[#allocation70_spill] sm:$0xff]  ;;  %v768_v24 = vmul.f32 0.6931472, %v3171_v57 }
  0xf7   : > { %v3185_v61 = vpop.eup %1686  ;;  %1712 = vlog2.f32 %v3926_v26  ;;  %v3230_v26 = vmul.f32 1.442695, %v841_v58  ;;  %v3251_v36 = vmul.f32 1.442695, %v845_v0  ;;  %v3267_v0 = vmul.f32 1.442695, %v848_v46 }
  0xf8   : > { %v3191_v35 = vpop.eup %1688  ;;  %1714 = vlog2.f32 %v3927_v27  ;;  %v3236_v27 = vmul.f32 1.442695, %v842_v52  ;;  %v3253_v52 = vmul.f32 1.442695, %v846_v29 }
  0xf9   : > { %v3198_v15 = vpop.eup %1690  ;;  %1716 = vlog2.f32 %v3928_v3  ;;  %v760_v3 = vmul.f32 0.6931472, %v3141_v48  ;;  %v850_v48 = vmul.f32 %v3033_v19, %v756_v10  ;;  %v851_v10 = vmul.f32 %v3033_v19, %v758_v55 }
  0xfa   : > { %v3205_v25 = vpop.eup %1692  ;;  %1718 = vlog2.f32 %v3929_v23  ;;  %v3934_v23 = vld [vmem:[#allocation72_spill] sm:$0xff]  ;;  %v774_v57 = vmul.f32 0.6931472, %v3191_v35  ;;  %v856_v35 = vmul.f32 %v3033_v19, %v768_v24 }
  0xfb   : > { %v3211_v60 = vpop.eup %1694  ;;  %1720 = vlog2.f32 %v3930_v40  ;;  %v849_v40 = vmul.f32 %v3033_v19, %v754_v16  ;;  %v764_v16 = vmul.f32 0.6931472, %v3156_v39  ;;  %v770_v39 = vmul.f32 0.6931472, %v3178_v47 }
  0xfc   : > { %v3219_v20 = vpop.eup %1696  ;;  %1722 = vlog2.f32 %v3931_v9  ;;  %v776_v47 = vmul.f32 0.6931472, %v3198_v15  ;;  %v778_v15 = vmul.f32 0.6931472, %v3205_v25 }
  0xfd   : > { %v3225_v45 = vpop.eup %1698  ;;  %1724 = vlog2.f32 %v3932_v1 }
  0xfe   : > { %v3232_v44 = vpop.eup %1700  ;;  %1726 = vlog2.f32 %v3933_v56  ;;  %v853_v56 = vmul.f32 %v3033_v19, %v762_v4  ;;  %v860_v25 = vmul.f32 %v3033_v19, %v776_v47 }
  0xff   : > { %v3240_v32 = vpop.eup %1702  ;;  %1728 = vlog2.f32 %v3934_v23  ;;  %v786_v47 = vmul.f32 0.6931472, %v3232_v44 }
 0x100   : > { %v3247_v58 = vpop.eup %1704  ;;  %1730 = vpow2.f32 %v3057_v43  ;;  %v766_v43 = vmul.f32 0.6931472, %v3163_v11  ;;  %v772_v11 = vmul.f32 0.6931472, %v3185_v61  ;;  %v854_v61 = vmul.f32 %v3033_v19, %v764_v16 }
 0x101   : > { %v3255_v22 = vpop.eup %1706  ;;  %1732 = vpow2.f32 %v3068_v18  ;;  %v852_v18 = vmul.f32 %v3033_v19, %v760_v3  ;;  %v3299_v3 = vmul.f32 1.442695, %v851_v10  ;;  %v3314_v16 = vmul.f32 1.442695, %v853_v56 }
 0x102   : > { %v3262_v9 = vpop.eup %1708  ;;  %1734 = vpow2.f32 %v3074_v5  ;;  %v3280_v5 = vmul.f32 1.442695, %v849_v40  ;;  %v857_v40 = vmul.f32 %v3033_v19, %v770_v39  ;;  %v858_v4 = vmul.f32 %v3033_v19, %v772_v11 }
 0x103   : > { %v3269_v29 = vpop.eup %1710  ;;  %1736 = vpow2.f32 %v3076_v51  ;;  %v3287_v51 = vmul.f32 1.442695, %v850_v48  ;;  %v780_v48 = vmul.f32 0.6931472, %v3211_v60  ;;  %v3320_v24 = vmul.f32 1.442695, %v854_v61 }
 0x104   : > { %v3275_v1 = vpop.eup %1712  ;;  %1738 = vpow2.f32 %v3081_v53  ;;  %v855_v53 = vmul.f32 %v3033_v19, %v766_v43  ;;  %v782_v60 = vmul.f32 0.6931472, %v3219_v20  ;;  %v861_v11 = vmul.f32 %v3033_v19, %v778_v15 }
 0x105   : > { %v3282_v8 = vpop.eup %1714  ;;  %1740 = vpow2.f32 %v3087_v6  ;;  %v3301_v6 = vmul.f32 1.442695, %v852_v18  ;;  %v784_v18 = vmul.f32 0.6931472, %v3225_v45  ;;  %v862_v20 = vmul.f32 %v3033_v19, %v780_v48 }
 0x106   : > { %v3289_v46 = vpop.eup %1716  ;;  %1742 = vpow2.f32 %v3089_v13  ;;  %v3322_v10 = vmul.f32 1.442695, %v855_v53  ;;  %v788_v61 = vmul.f32 0.6931472, %v3240_v32  ;;  %v3346_v53 = vmul.f32 1.442695, %v860_v25 }
 0x107   : > { %v3295_v55 = vpop.eup %1718  ;;  %1744 = vpow2.f32 %v3095_v38  ;;  %v859_v38 = vmul.f32 %v3033_v19, %v774_v57  ;;  %v3337_v57 = vmul.f32 1.442695, %v858_v4  ;;  %v863_v15 = vmul.f32 %v3033_v19, %v782_v60 }
 0x108   : > { %v3303_v23 = vpop.eup %1720  ;;  %1746 = vpow2.f32 %v3101_v21  ;;  %v864_v44 = vmul.f32 %v3033_v19, %v784_v18  ;;  %v790_v4 = vmul.f32 0.6931472, %v3247_v58  ;;  %v865_v25 = vmul.f32 %v3033_v19, %v786_v47 }
 0x109   : > { %v3309_v13 = vpop.eup %1722  ;;  %1748 = vpow2.f32 %v3113_v62  ;;  %v3329_v62 = vmul.f32 1.442695, %v856_v35  ;;  %v3359_v60 = vmul.f32 1.442695, %v861_v11  ;;  %v866_v18 = vmul.f32 %v3033_v19, %v788_v61 }
 0x10a   : > { %v3316_v43 = vpop.eup %1724  ;;  %1750 = vpow2.f32 %v3119_v14  ;;  %v3335_v14 = vmul.f32 1.442695, %v857_v40  ;;  %v3368_v47 = vmul.f32 1.442695, %v863_v15  ;;  %v796_v11 = vmul.f32 0.6931472, %v3269_v29 }
 0x10b   : > { %v3324_v21 = vpop.eup %1726  ;;  %1752 = vpow2.f32 %v3131_v17  ;;  %v3342_v17 = vmul.f32 1.442695, %v859_v38  ;;  %v792_v38 = vmul.f32 0.6931472, %v3255_v22  ;;  %v3366_v22 = vmul.f32 1.442695, %v862_v20 }
 0x10c   : > { %v3331_v39 = vpop.eup %1728  ;;  %1754 = vpow2.f32 %v3133_v12  ;;  %v867_v61 = vmul.f32 %v3033_v19, %v790_v4  ;;  %v3383_v29 = vmul.f32 1.442695, %v866_v18  ;;  %v800_v4 = vmul.f32 0.6931472, %v3282_v8 }
 0x10d   : > { %v1731_v56 = vpop.eup %1730  ;;  %1756 = vpow2.f32 %v3146_v2  ;;  %v868_v15 = vmul.f32 %v3033_v19, %v792_v38 }
 0x10e   : > { %v1733_v45 = vpop.eup %1732  ;;  %1758 = vpow2.f32 %v3152_v28  ;;  %v1009_v12 = vsel %vm1008_vm8, %v1731_v56, 0.0 }
 0x10f   : > { %v1735_v35 = vpop.eup %1734  ;;  %1760 = vpow2.f32 %v3154_v33  ;;  %v1010_v2 = vsel %vm1008_vm8, %v1733_v45, 0.0  ;;  %v794_v45 = vmul.f32 0.6931472, %v3262_v9  ;;  %v3401_v18 = vmul.f32 1.442695, %v868_v15 }
 0x110   : > { %v1737_v40 = vpop.eup %1736  ;;  %1762 = vpow2.f32 %v3161_v41  ;;  %v1011_v32 = vadd.f32 %v1010_v2, %v1009_v12  ;;  %v1012_v28 = vsel %vm1008_vm8, %v1735_v35, 0.0  ;;  %v798_v35 = vmul.f32 0.6931472, %v3275_v1 }
 0x111   : > { %v1739_v48 = vpop.eup %1738  ;;  %1764 = vpow2.f32 %v3167_v63  ;;  %v1014_v41 = vsel %vm1008_vm8, %v1737_v40, 0.0 }
 0x112   : > { %v1741_v33 = vpop.eup %1740  ;;  %1766 = vpow2.f32 %v3169_v59  ;;  %v1013_v58 = vadd.f32 %v1012_v28, %v1011_v32  ;;  %v3375_v59 = vmul.f32 1.442695, %v864_v44  ;;  %v1016_v2 = vsel %vm1008_vm8, %v1739_v48, 0.0 }
 0x113   : > { %v1743_v56 = vpop.eup %1742  ;;  %1768 = vpow2.f32 %v3176_v7  ;;  %v3379_v7 = vmul.f32 1.442695, %v865_v25  ;;  %v869_v44 = vmul.f32 %v3033_v19, %v794_v45  ;;  %v870_v32 = vmul.f32 %v3033_v19, %v796_v11 }
 0x114   : > { %v3370_v63 = vpop.eup %1744  ;;  %1770 = vpow2.f32 %v3183_v50  ;;  %v1015_v9 = vadd.f32 %v1014_v41, %v1013_v58  ;;  %v802_v48 = vmul.f32 0.6931472, %v3289_v46  ;;  %v871_v38 = vmul.f32 %v3033_v19, %v798_v35 }
 0x115   : > { %v1747_v12 = vpop.eup %1746  ;;  %1772 = vpow2.f32 %v3196_v37  ;;  %v1018_v8 = vsel %vm1008_vm8, %v1741_v33, 0.0  ;;  %v804_v41 = vmul.f32 0.6931472, %v3295_v55  ;;  %v3408_v46 = vmul.f32 1.442695, %v869_v44 }
 0x116   : > { %v1749_v20 = vpop.eup %1748  ;;  %1774 = vpow2.f32 %v3203_v42  ;;  %v1030_v1 = vsel %vm1008_vm8, %v1747_v12, 0.0  ;;  %v3393_v42 = vmul.f32 1.442695, %v867_v61  ;;  %v806_v11 = vmul.f32 0.6931472, %v3303_v23 }
 0x117   : > { %v1751_v50 = vpop.eup %1750  ;;  %1776 = vpow2.f32 %v3215_v31  ;;  %v1031_v37 = vsel %vm1008_vm8, %v1749_v20, 0.0  ;;  %v1017_v31 = vadd.f32 %v1016_v2, %v1015_v9  ;;  %v3416_v33 = vmul.f32 1.442695, %v870_v32 }
 0x118   : > { %v1753_v40 = vpop.eup %1752  ;;  %1778 = vpow2.f32 %v3217_v54  ;;  %v1032_v58 = vadd.f32 %v1031_v37, %v1030_v1  ;;  %v873_v12 = vmul.f32 %v3033_v19, %v802_v48  ;;  %v1020_v9 = vsel %vm1008_vm8, %v1743_v56, 0.0 }
 0x119   : > { %v1755_v28 = vpop.eup %1754  ;;  %1780 = vpow2.f32 %v3230_v26  ;;  %v1033_v26 = vsel %vm1008_vm8, %v1751_v50, 0.0  ;;  %v1019_v55 = vadd.f32 %v1018_v8, %v1017_v31  ;;  %v1035_v2 = vsel %vm1008_vm8, %v1753_v40, 0.0 }
 0x11a   : > { %v3398_v25 = vpop.eup %1756  ;;  %1782 = vpow2.f32 %v3236_v27  ;;  %v872_v27 = vmul.f32 %v3033_v19, %v800_v4  ;;  %v1034_v23 = vadd.f32 %v1033_v26, %v1032_v58  ;;  %v874_v44 = vmul.f32 %v3033_v19, %v804_v41 }
 0x11b   : > { %v3404_v54 = vpop.eup %1758  ;;  %1784 = vpow2.f32 %v3238_v30  ;;  %v3420_v30 = vmul.f32 1.442695, %v871_v38  ;;  %v1021_v37 = vadd.f32 %v1020_v9, %v1019_v55  ;;  %v1022_v40 = vsel %vm1008_vm8, %v3370_v63, 0.0 }
 0x11c   : > { %v3411_v45 = vpop.eup %1760  ;;  %1786 = vpow2.f32 %v3245_v34  ;;  %v808_v34 = vmul.f32 0.6931472, %v3309_v13  ;;  %v1036_v32 = vadd.f32 %v1035_v2, %v1034_v23  ;;  %v810_v38 = vmul.f32 0.6931472, %v3316_v43 }
 0x11d   : > { %v1763_v61 = vpop.eup %1762  ;;  %1788 = vpow2.f32 %v3251_v36  ;;  %v875_v31 = vmul.f32 %v3033_v19, %v806_v11  ;;  %v3444_v58 = vmul.f32 1.442695, %v873_v12  ;;  %v812_v26 = vmul.f32 0.6931472, %v3324_v21 }
 0x11e   : > { %v1765_v35 = vpop.eup %1764  ;;  %1790 = vpow2.f32 %v3253_v52  ;;  %v1051_v20 = vsel %vm1008_vm8, %v1763_v61, 0.0  ;;  %v3431_v52 = vmul.f32 1.442695, %v872_v27  ;;  %v3449_v27 = vmul.f32 %v3033_v19, %v808_v34 }
 0x11f   : > { %v1767_v15 = vpop.eup %1766  ;;  %1792 = vpow2.f32 %v3260_v49  ;;  %v1052_v36 = vsel %vm1008_vm8, %v1765_v35, 0.0  ;;  %v1023_v43 = vadd.f32 %v1022_v40, %v1021_v37  ;;  %v1039_v11 = vsel %vm1008_vm8, %v3398_v25, 0.0 }
 0x120   : > { %v1769_v50 = vpop.eup %1768  ;;  %1794 = vpow2.f32 %v3267_v0  ;;  %v1053_v56 = vadd.f32 %v1052_v36, %v1051_v20  ;;  %v1054_v13 = vsel %vm1008_vm8, %v1767_v15, 0.0  ;;  %v877_v9 = vmul.f32 %v3033_v19, %v810_v38 }
 0x121   : > { %v1771_v1 = vpop.eup %1770  ;;  %1796 = vpow2.f32 %v3280_v5  ;;  %v1056_v49 = vsel %vm1008_vm8, %v1769_v50, 0.0  ;;  %v1037_v5 = vsel %vm1008_vm8, %v1755_v28, 0.0  ;;  %v3453_v28 = vmul.f32 1.442695, %v874_v44 }
 0x122   : > { %v1773_v4 = vpop.eup %1772  ;;  %1798 = vpow2.f32 %v3287_v51  ;;  %v1055_v48 = vadd.f32 %v1054_v13, %v1053_v56  ;;  %v1058_v41 = vsel %vm1008_vm8, %v1771_v1, 0.0  ;;  %v1024_v25 = vrot.slane %v1023_v43, 4 }
 0x123   : > { %v1775_v0 = vpop.eup %1774  ;;  %1800 = vpow2.f32 %v3299_v3  ;;  %v3467_v34 = vmul.f32 1.442695, %v875_v31  ;;  %v3474_v56 = vmul.f32 %v3033_v19, %v812_v26  ;;  %v1000_v26 = vmul.f32 1.442695, %v3449_v27 }
 0x124   : > { %v1777_v8 = vpop.eup %1776  ;;  %1802 = vpow2.f32 %v3301_v6  ;;  %v1057_v51 = vadd.f32 %v1056_v49, %v1055_v48  ;;  %v1038_v6 = vadd.f32 %v1037_v5, %v1036_v32  ;;  %v3480_v13 = vadd.f32 %v1024_v25, %v1023_v43 }
 0x125   : > { %v1779_v63 = vpop.eup %1778  ;;  %1804 = vpow2.f32 %v3314_v16  ;;  %v814_v16 = vmul.f32 0.6931472, %v3331_v39 }
 0x126   : > { %v1781_v3 = vpop.eup %1780  ;;  %1806 = vpow2.f32 %v3320_v24  ;;  %v1059_v12 = vadd.f32 %v1058_v41, %v1057_v51  ;;  %v1072_v21 = vsel %vm1008_vm8, %v1779_v63, 0.0  ;;  %v1060_v24 = vsel %vm1008_vm8, %v1773_v4, 0.0 }
 0x127   : > { %v1783_v61 = vpop.eup %1782  ;;  %1808 = vpow2.f32 %v3322_v10  ;;  %v1073_v55 = vsel %vm1008_vm8, %v1781_v3, 0.0  ;;  %v1040_v2 = vadd.f32 %v1039_v11, %v1038_v6 }
 0x128   : > { %v1785_v35 = vpop.eup %1784  ;;  %1810 = vpow2.f32 %v3329_v62  ;;  %v1074_v20 = vadd.f32 %v1073_v55, %v1072_v21  ;;  %v1075_v10 = vsel %vm1008_vm8, %v1783_v61, 0.0  ;;  %v1041_v62 = vsel %vm1008_vm8, %v3404_v54, 0.0 }
 0x129   : > { %v1787_v23 = vpop.eup %1786  ;;  %1812 = vpow2.f32 %v3335_v14  ;;  %v1077_v39 = vsel %vm1008_vm8, %v1785_v35, 0.0  ;;  %v1061_v50 = vadd.f32 %v1060_v24, %v1059_v12  ;;  %v1042_v4 = vadd.f32 %v1041_v62, %v1040_v2 }
 0x12a   : > { %v1789_v15 = vpop.eup %1788  ;;  %1814 = vpow2.f32 %v3337_v57  ;;  %v1076_v14 = vadd.f32 %v1075_v10, %v1074_v20  ;;  %v1062_v57 = vsel %vm1008_vm8, %v1775_v0, 0.0  ;;  %v1079_v1 = vsel %vm1008_vm8, %v1787_v23, 0.0 }
 0x12b   : > { %v1791_v36 = vpop.eup %1790  ;;  %1816 = vpow2.f32 %v3342_v17  ;;  %v1043_v17 = vsel %vm1008_vm8, %v3411_v45, 0.0  ;;  %v1081_v40 = vsel %vm1008_vm8, %v1789_v15, 0.0  ;;  %v1063_v48 = vadd.f32 %v1062_v57, %v1061_v50 }
 0x12c   : > { %v1793_v44 = vpop.eup %1792  ;;  %1818 = vpow2.f32 %v3346_v53  ;;  %v1078_v54 = vadd.f32 %v1077_v39, %v1076_v14  ;;  %v1064_v45 = vsel %vm1008_vm8, %v1777_v8, 0.0  ;;  %v1083_v31 = vsel %vm1008_vm8, %v1791_v36, 0.0 }
 0x12d   : > { %v1795_v37 = vpop.eup %1794  ;;  %1820 = vpow2.f32 %v3359_v60  ;;  %v1044_v43 = vadd.f32 %v1043_v17, %v1042_v4  ;;  %v879_v8 = vmul.f32 %v3033_v19, %v814_v16  ;;  %v1065_v6 = vadd.f32 %v1064_v45, %v1063_v48 }
 0x12e   : > { %v1797_v49 = vpop.eup %1796  ;;  %1822 = vpow2.f32 %v3366_v22  ;;  %v1093_v53 = vsel %vm1008_vm8, %v1795_v37, 0.0  ;;  %v1080_v0 = vadd.f32 %v1079_v1, %v1078_v54  ;;  %v1002_v61 = vmul.f32 1.442695, %v877_v9 }
 0x12f   : > { %v1799_v32 = vpop.eup %1798  ;;  %1824 = vpow2.f32 %v3368_v47  ;;  %v1094_v60 = vsel %vm1008_vm8, %v1797_v49, 0.0  ;;  %v1085_v27 = vsel %vm1008_vm8, %v1793_v44, 0.0  ;;  %v1066_v9 = vrot.slane %v1065_v6, 4 }
 0x130   : > { %v1801_v38 = vpop.eup %1800  ;;  %1826 = vpow2.f32 %v3375_v59  ;;  %v1095_v22 = vadd.f32 %v1094_v60, %v1093_v53  ;;  %v1082_v51 = vadd.f32 %v1081_v40, %v1080_v0  ;;  %v1096_v41 = vsel %vm1008_vm8, %v1799_v32, 0.0 }
 0x131   : > { %v1803_v5 = vpop.eup %1802  ;;  %1828 = vpow2.f32 %v3379_v7  ;;  %v1098_v47 = vsel %vm1008_vm8, %v1801_v38, 0.0  ;;  %v1006_v49 = vmul.f32 1.442695, %v879_v8  ;;  %v1067_v4 = vadd.f32 %v1066_v9, %v1065_v6 }
 0x132   : > { %v1805_v63 = vpop.eup %1804  ;;  %1830 = vpow2.f32 %v3383_v29  ;;  %v1097_v59 = vadd.f32 %v1096_v41, %v1095_v22  ;;  %v1100_v7 = vsel %vm1008_vm8, %v1803_v5, 0.0  ;;  %v1084_v12 = vadd.f32 %v1083_v31, %v1082_v51 }
 0x133   : > { %v1807_v3 = vpop.eup %1806  ;;  %1832 = vpow2.f32 %v3393_v42  ;;  %v1026_v29 = vrot.slane %v3480_v13, 2  ;;  %v1102_v19 = vsel %vm1008_vm8, %v1805_v63, 0.0  ;;  %v1045_v42 = vrot.slane %v1044_v43, 4 }
 0x134   : > { %v1809_v11 = vpop.eup %1808  ;;  %1834 = vpow2.f32 %v3401_v18  ;;  %v1099_v21 = vadd.f32 %v1098_v47, %v1097_v59  ;;  %v1104_v23 = vsel %vm1008_vm8, %v1807_v3, 0.0  ;;  %v1086_v20 = vadd.f32 %v1085_v27, %v1084_v12 }
 0x135   : > { %v1811_v55 = vpop.eup %1810  ;;  %1836 = vpow2.f32 %v3408_v46  ;;  %v1046_v62 = vadd.f32 %v1045_v42, %v1044_v43  ;;  %v1027_v53 = vadd.f32 %v1026_v29, %v3480_v13  ;;  %v1068_v13 = vrot.slane %v1067_v4, 2 }
 0x136   : > { %v1813_v35 = vpop.eup %1812  ;;  %1838 = vpow2.f32 %v3416_v33  ;;  %v1101_v16 = vadd.f32 %v1100_v7, %v1099_v21  ;;  %v1114_v24 = vsel %vm1008_vm8, %v1811_v55, 0.0  ;;  %v1106_v33 = vsel %vm1008_vm8, %v1809_v11, 0.0 }
 0x137   : > { %v1815_v18 = vpop.eup %1814  ;;  %1840 = vpow2.f32 %v3420_v30  ;;  %v1115_v46 = vsel %vm1008_vm8, %v1813_v35, 0.0  ;;  %v1087_v1 = vrot.slane %v1086_v20, 4  ;;  %v1047_v32 = vrot.slane %v1046_v62, 2 }
 0x138   : > { %v1817_v25 = vpop.eup %1816  ;;  %1842 = vpow2.f32 %v3431_v52  ;;  %v1103_v10 = vadd.f32 %v1102_v19, %v1101_v16  ;;  %v1116_v15 = vadd.f32 %v1115_v46, %v1114_v24  ;;  %v1117_v39 = vsel %vm1008_vm8, %v1815_v18, 0.0 }
 0x139   : > { %v1819_v2 = vpop.eup %1818  ;;  %1844 = vpow2.f32 %v3444_v58  ;;  %v1119_v30 = vsel %vm1008_vm8, %v1817_v25, 0.0  ;;  %v1004_v52 = vmul.f32 1.442695, %v3474_v56  ;;  %v1088_v31 = vadd.f32 %v1087_v1, %v1086_v20 }
 0x13a   : > { %v1821_v36 = vpop.eup %1820  ;;  %1846 = vpow2.f32 %v3453_v28  ;;  %v1105_v50 = vadd.f32 %v1104_v23, %v1103_v10  ;;  %v1118_v14 = vadd.f32 %v1117_v39, %v1116_v15  ;;  %v1121_v57 = vsel %vm1008_vm8, %v1819_v2, 0.0 }
 0x13b   : > { %v1823_v44 = vpop.eup %1822  ;;  %1848 = vpow2.f32 %v3467_v34  ;;  %v1123_v28 = vsel %vm1008_vm8, %v1821_v36, 0.0  ;;  %v1048_v43 = vadd.f32 %v1047_v32, %v1046_v62  ;;  %v1028_v6 = vrot.slane %v1027_v53, 1 }
 0x13c   : > { %v1825_v58 = vpop.eup %1824  ;;  %1850 = vpow2.f32 %v1000_v26  ;;  %v1107_v37 = vadd.f32 %v1106_v33, %v1105_v50  ;;  %v1120_v17 = vadd.f32 %v1119_v30, %v1118_v14  ;;  %v1125_v60 = vsel %vm1008_vm8, %v1823_v44, 0.0 }
 0x13d   : > { %v1827_v54 = vpop.eup %1826  ;;  %1852 = vpow2.f32 %v1002_v61  ;;  %v1127_v47 = vsel %vm1008_vm8, %v1825_v58, 0.0  ;;  %v1089_v12 = vrot.slane %v1088_v31, 2  ;;  %v1069_v27 = vadd.f32 %v1068_v13, %v1067_v4 }
 0x13e   : > { %v1829_v40 = vpop.eup %1828  ;;  %v1122_v34 = vadd.f32 %v1121_v57, %v1120_v17  ;;  %v1135_v56 = vsel %vm1008_vm8, %v1827_v54, 0.0  ;;  %1854 = vpow2.f32 %v1004_v52  ;;  %v1108_v0 = vrot.slane %v1107_v37, 4 }
 0x13f   : > { %v1831_v48 = vpop.eup %1830  ;;  %v1136_v38 = vsel %vm1008_vm8, %v1829_v40, 0.0  ;;  %1856 = vpow2.f32 %v1006_v49  ;;  %v1049_v42 = vrot.slane %v1048_v43, 1  ;;  %v1029_v23 = vadd.f32 %v1028_v6, %v1027_v53 }
 0x140   : > { %v1833_v45 = vpop.eup %1832  ;;  %v1124_v22 = vadd.f32 %v1123_v28, %v1122_v34  ;;  %v1137_v5 = vadd.f32 %v1136_v38, %v1135_v56  ;;  %v1138_v51 = vsel %vm1008_vm8, %v1831_v48, 0.0  ;;  %v1109_v7 = vadd.f32 %v1108_v0, %v1107_v37 }
 0x141   : > { %v1835_v41 = vpop.eup %1834  ;;  %v1140_v63 = vsel %vm1008_vm8, %v1833_v45, 0.0  ;;  %v1090_v15 = vadd.f32 %v1089_v12, %v1088_v31  ;;  %v1070_v36 = vrot.slane %v1069_v27, 1  ;;  %v1050_v52 = vadd.f32 %v1049_v42, %v1048_v43 }
 0x142   : > { %v1837_v26 = vpop.eup %1836  ;;  %v1126_v59 = vadd.f32 %v1125_v60, %v1124_v22  ;;  %v1139_v3 = vadd.f32 %v1138_v51, %v1137_v5  ;;  %v1142_v11 = vsel %vm1008_vm8, %v1835_v41, 0.0  ;;  %v1110_v46 = vrot.slane %v1109_v7, 2 }
 0x143   : > { %v1839_v8 = vpop.eup %1838  ;;  %v1144_v19 = vsel %vm1008_vm8, %v1837_v26, 0.0  ;;  %v1091_v49 = vrot.slane %v1090_v15, 1  ;;  %v1071_v40 = vadd.f32 %v1070_v36, %v1069_v27  ;;  %v1178_v32 = vmul.f32 0.015625, %v1029_v23 }
 0x144   : > { %v1841_v61 = vpop.eup %1840  ;;  %v1128_v21 = vadd.f32 %v1127_v47, %v1126_v59  ;;  %v1141_v55 = vadd.f32 %v1140_v63, %v1139_v3  ;;  %v1146_v25 = vsel %vm1008_vm8, %v1839_v8, 0.0  ;;  %v1111_v37 = vadd.f32 %v1110_v46, %v1109_v7 }
 0x145   : > { %v1843_v29 = vpop.eup %1842  ;;  %v1148_v62 = vsel %vm1008_vm8, %v1841_v61, 0.0  ;;  %v1179_v60 = vmul.f32 0.015625, %v1050_v52  ;;  %v1092_v31 = vadd.f32 %v1091_v49, %v1090_v15  ;;  %v1180_v41 = vmul.f32 0.015625, %v1071_v40 }
 0x146   : > { %v1845_v35 = vpop.eup %1844  ;;  %v1129_v16 = vrot.slane %v1128_v21, 4  ;;  %v1143_v24 = vadd.f32 %v1142_v11, %v1141_v55  ;;  %v1156_v18 = vsel %vm1008_vm8, %v1843_v29, 0.0  ;;  %v1112_v38 = vrot.slane %v1111_v37, 1 }
 0x147   : > { %v1847_v9 = vpop.eup %1846  ;;  %v1157_v20 = vsel %vm1008_vm8, %v1845_v35, 0.0  ;;  %v1195_v26 = vsel %vm1194_vm9, %v1179_v60, %v1178_v32  ;;  %v1181_v8 = vmul.f32 0.015625, %v1092_v31 }
 0x148   : > { %v1849_v10 = vpop.eup %1848  ;;  %v1130_v2 = vadd.f32 %v1129_v16, %v1128_v21  ;;  %v1145_v33 = vadd.f32 %v1144_v19, %v1143_v24  ;;  %v1158_v39 = vadd.f32 %v1157_v20, %v1156_v18  ;;  %v1159_v50 = vsel %vm1008_vm8, %v1847_v9, 0.0 }
 0x149   : > { %v1851_v30 = vpop.eup %1850  ;;  %v1161_v14 = vsel %vm1008_vm8, %v1849_v10, 0.0  ;;  %v1113_v43 = vadd.f32 %v1112_v38, %v1111_v37  ;;  %v1197_v6 = vsel %vm1196_vm10, %v1180_v41, %v1195_v26 }
 0x14a   : > { %v1853_v44 = vpop.eup %1852  ;;  %v1131_v57 = vrot.slane %v1130_v2, 2  ;;  %v1147_v58 = vadd.f32 %v1146_v25, %v1145_v33  ;;  %v1160_v1 = vadd.f32 %v1159_v50, %v1158_v39  ;;  %v1163_v17 = vsel %vm1008_vm8, %v1851_v30, 0.0 }
 0x14b   : > { %v1855_v54 = vpop.eup %1854  ;;  %v1165_v53 = vsel %vm1008_vm8, %v1853_v44, 0.0  ;;  %v1182_v12 = vmul.f32 0.015625, %v1113_v43  ;;  %v1199_v55 = vsel %vm1198_vm11, %v1181_v8, %v1197_v6 }
 0x14c   : > { %v1149_v4 = vadd.f32 %v1148_v62, %v1147_v58  ;;  %v1162_v28 = vadd.f32 %v1161_v14, %v1160_v1  ;;  %v1857_v34 = vpop.eup %1856  ;;  %v1132_v56 = vadd.f32 %v1131_v57, %v1130_v2  ;;  %v1167_v45 = vsel %vm1008_vm8, %v1855_v54, 0.0 }
 0x14d   : > { %v1169_v51 = vsel %vm1008_vm8, %v1857_v34, 0.0  ;;  %v1201_v35 = vsel %vm1200_vm12, %v1182_v12, %v1199_v55 }
 0x14e   : > { %v1150_v48 = vrot.slane %v1149_v4, 4  ;;  %v1164_v0 = vadd.f32 %v1163_v17, %v1162_v28  ;;  %v1133_v13 = vrot.slane %v1132_v56, 1 }
 0x150   : > { %v1151_v22 = vadd.f32 %v1150_v48, %v1149_v4  ;;  %v1166_v5 = vadd.f32 %v1165_v53, %v1164_v0  ;;  %v1134_v7 = vadd.f32 %v1133_v13, %v1132_v56 }
 0x152   : > { %v1152_v47 = vrot.slane %v1151_v22, 2  ;;  %v1168_v63 = vadd.f32 %v1167_v45, %v1166_v5  ;;  %v1183_v19 = vmul.f32 0.015625, %v1134_v7 }
 0x154   : > { %v1153_v59 = vadd.f32 %v1152_v47, %v1151_v22  ;;  %v1170_v3 = vadd.f32 %v1169_v51, %v1168_v63  ;;  %v1203_v18 = vsel %vm1202_vm13, %v1183_v19, %v1201_v35 }
 0x156   : > { %v1154_v11 = vrot.slane %v1153_v59, 1  ;;  %v1171_v61 = vrot.slane %v1170_v3, 4 }
 0x158   : > { %v1172_v21 = vadd.f32 %v1171_v61, %v1170_v3  ;;  %v1155_v29 = vadd.f32 %v1154_v11, %v1153_v59 }
 0x15a   : > { %v1173_v27 = vrot.slane %v1172_v21, 2  ;;  %v1184_v16 = vmul.f32 0.015625, %v1155_v29 }
 0x15c   : > { %v1174_v42 = vadd.f32 %v1173_v27, %v1172_v21  ;;  %v1205_v23 = vsel %vm1204_vm14, %v1184_v16, %v1203_v18 }
 0x15e   : > { %v1175_v24 = vrot.slane %v1174_v42, 1 }
 0x160   : > { %v1176_v9 = vadd.f32 %v1175_v24, %v1174_v42 }
 0x162   : > { %v1185_v46 = vmul.f32 0.015625, %v1176_v9 }
 0x164   : > { %v1207_v25 = vsel %vm1206_vm15, %v1185_v46, %v1205_v23 }
 0x165   : > { %1209 = vst.msk [vmem:[#allocation2] sm:$0xff] %vm1008_vm8, %v1207_v25 }
 0x166 PF: > { %v1220_v20 = vld [vmem:[%s3606_s2 + $0x18] sm:$0xff]  ;;  %v1939_v10 = vmov 0.0   ;;  %v1219_v15 = vld [vmem:[%s3606_s2 + $0x10] sm:$0xff]  ;;  %vm1940_vm0 = vmmov 0   ;;  %v1218_v33 = vld [vmem:[%s3606_s2 + $0x8] sm:$0xff]  ;;  %v1213_v36 = vstv %s2021_s5  ;;  %vm1221_vm1 = vcmask 261120  }
 0x167   : > { %1549 = vmatprep.subr.mxu0 %v1939_v10  ;;  %1557 = vmatprep.mubr.msk.f32.mxu0 %vm1940_vm0, %v1939_v10  ;;  %v1217_v39 = vld [vmem:[%s3606_s2] sm:$0xff]  ;;  %s1381_s4 = sshll.u32 %s1986_s20, 7  ;;  %s1310_s6 = sshll.u32 %s146_s12, 4  ;;  %s3561_s6 = int_to_ptr.vmem [resolvable:$true] %s1310_s6 }
 0x168   : > { %1550 = vmatpush3.msra.mxu0 %v1220_v20  ;;  %s3559_s9 = scalar_lea.hbm %s3607_s3, %s1381_s4  ;;  %s1297_s5 = scalar_lea.sflag [#allocation6], %s144_s28 }
 0x169   : > { %1551 = vmatprep.subr.mxu0 %v1939_v10  ;;  %s1874_s10 = scalar_lea.vmem %s3561_s6, 128  ;;  %s1941_s20 = smov [#allocation5]  }
 0x16a   : > { %1552 = vmatpush3.msra.mxu0 %v1219_v15  ;;  %p1875_p3 = scmp.ne.s32.totalorder %s3561_s6, %s1874_s10  ;;  %s1878_s11 = sshll.u32 %s1941_s20, 4  ;;  %s1879_s11 = int_to_ptr.vmem [resolvable:$false] %s1878_s11 }
 0x16b   : > { %1553 = vmatprep.subr.mxu0 %v1939_v10  ;;  %s1880_s13 = scalar_lea.vmem %s1879_s11, 256  ;;  %p1881_p6 = scmp.lt.s32.totalorder %s3561_s6, %s1879_s11 }
 0x16c   : > { %v1210_v2 = vld [vmem:[#allocation2] sm:$0xff]  ;;  %1554 = vmatpush3.msra.mxu0 %v1218_v33  ;;  %p1876_p4 = pnand %p1875_p3, %p2003_p10  ;;  %p1882_p7 = scmp.lt.s32.totalorder %s1880_s13, %s1874_s10 }
 0x16d   : > { %1858 = vlog2.f32 %v1210_v2  ;;  %1555 = vmatprep.subr.mxu0 %v1939_v10 }
 0x16e   : > { %1556 = vmatpush3.msra.mxu0 %v1217_v39  ;;  %p1877_p5 = pneg %p1876_p4  ;;  %p1883_p8 = por %p1882_p7, %p1881_p6 }
 0x170   : > { %p1884_p9 = pnand %p1883_p8, %p1877_p5 }
 0x17a   : > { %v1859_v30 = vpop.eup %1858 }
 0x17b   : > { %v1212_v62 = vmul.f32 0.6931472, %v1859_v30 }
 0x17d   : > { %v1214_v50 = vmul.f32 %v1213_v36, %v1212_v62 }
 0x17f   : > { %v1215_v14 = vmul.f32 1.442695, %v1214_v50 }
 0x181   : > { %1860 = vpow2.f32 %v1215_v14 }
 0x18e   : > { %v1861_v44 = vpop.eup %1860 }
 0x18f   : > { %1558 = vmatmul.mubr.msk.f32.vlgmr.msra.gmra.mxu0 %vm1221_vm1, %v1861_v44 }
 0x24f   : > { %v1291_v52 = vpop.f32.mrf.mxu0 }
 0x250   : > { %1295 = vst [vmem:[%s146_s12] sm:$0xff] %v1291_v52 }
 0x251   : > { %v1559_v57 = vpop.f32.mrf.mxu0 }
 0x252   : > { %1887 = shalt.err (!%p1884_p9)
}
 0x253   : > { %s1888_s30 = scalar_lea.hbm %s3559_s9, 128  ;;  %s1892_s14 = scalar_lea.hbm %s3607_s3, 256 }
 0x254   : > { %p1889_p12 = scmp.ne.s32.totalorder %s3559_s9, %s1888_s30  ;;  %p1893_p1 = scmp.lt.s32.totalorder %s3559_s9, %s3607_s3 }
 0x255   : > { %p1894_p2 = scmp.lt.s32.totalorder %s1892_s14, %s1888_s30 }
 0x256   : > { %p1890_p13 = pnand %p1889_p12, %p2003_p10 }
 0x257   : > { %p1895_p3 = por %p1894_p2, %p1893_p1 }
 0x258   : > { %p1891_p0 = pneg %p1890_p13 }
 0x25a   : > { %p1896_p4 = pnand %p1895_p3, %p1891_p0 }
 0x25c   : > { %1899 = shalt.err (!%p1896_p4)
}
 0x25d   : > { %1560 = dma.vmem_to_hbm [thread:$0]  (%p2003_p10), %s3561_s6, 128, %s3559_s9, %s1297_s5  }
 0x25e PF: > { %p1566_p5 = scmp.ge.s32.totalorder %s1936_s19, 2  ;;  %s1322_s21 = sand.u32 1, %s1924_s17  }
 0x25f   : > { %s1323_s23 = scalar_lea.sflag [#allocation6], %s1322_s21 }
 0x260   : > { %p1563_p6 = pnand %p1566_p5, %p2007_p11 }
 0x262   : > { %p1564_p7 = pneg %p1563_p6 }
 0x264   : > { %1919 = dma.done.wait (%p1564_p7), %s1323_s23, 128  }
 0x265   : > { %1921 = vsyncadd (%p1564_p7), %s1323_s23, 4294967168  ;;  %p19_p8 = scmp.ge.s32.totalorder %s1990_s22, 4   ;;  %s3935_s17 = smov %s1928_s18 }
 0x266   : > { %s3936_s18 = smov %s1932_s0  ;;  %s3937_s0 = smov %s2001_s25 }
 0x267   : > { %s3938_s19 = smov %s1990_s22  ;;  %21 = sbr.rel (!%p19_p8) target bundleno = 18 (0x12), region = 71 }
 0x26c   :  { %1328 = vsyncpa [#allocation6], 1 }
 0x26d   :  { %1330 = vsyncpa [#allocation6 + $0x1], 1 }

</bundles_post_ra>
